<compile_context>
chip_gen: v7x
topology: tpu7x:2x2x1
jax: 0.10.0
libtpu: 0.0.40
codegen_flags: <defaults>
</compile_context>

<pallas_src>
import functools

import jax
import jax.numpy as jnp
from jax.experimental import pallas as pl
from jax.experimental.pallas import tpu as pltpu

EPS = 1e-15
MAX_LOGVAR = 10.0

_LANES = 128
_SUBLANES = 8


def _round_up(x: int, m: int) -> int:
    return ((x + m - 1) // m) * m


def _vgae_loss_kernel(idx_i_ref, idx_j_ref, w_ref,
                      z_ref, mu_ref, logvar_ref, out_ref, *, kl_scale):
    """One edge tile per grid step; out_ref is a resident (1,1) accumulator."""
    step = pl.program_id(0)

    @pl.when(step == 0)
    def _init():
        out_ref[...] = jnp.zeros_like(out_ref)

    # ---- in-kernel gather of edge endpoints: one-hot(idx) @ z on the MXU ----
    e_tile = idx_i_ref.shape[0]
    n_pad = z_ref.shape[0]
    node_ids = jax.lax.broadcasted_iota(jnp.int32, (e_tile, n_pad), 1)
    oh_i = (node_ids == idx_i_ref[...]).astype(jnp.float32)        # (e, n_pad)
    oh_j = (node_ids == idx_j_ref[...]).astype(jnp.float32)
    z = z_ref[...]                                                 # (n_pad, d_pad)
    zi = jnp.dot(oh_i, z, preferred_element_type=jnp.float32,
                 precision=jax.lax.Precision.HIGHEST)              # exact row gather
    zj = jnp.dot(oh_j, z, preferred_element_type=jnp.float32,
                 precision=jax.lax.Precision.HIGHEST)

    # ---- reconstruction loss for this tile ----
    # w > 0 : positive edge, weight  1/E_pos  ->  -w * log(sigmoid + EPS)
    # w < 0 : negative edge, weight -1/E_neg  -> -|w| * log(1 - sigmoid + EPS)
    # w = 0 : padding edge (index 0)          ->  contributes exactly 0
    logit = jnp.sum(zi * zj, axis=1, keepdims=True)                # (e, 1), dense lanes
    prob = jax.nn.sigmoid(logit)
    w = w_ref[...]
    p_sel = jnp.where(w < 0.0, 1.0 - prob, prob)
    contrib = -jnp.abs(w) * jnp.log(p_sel + EPS)                   # (e, 1)
    out_ref[...] = out_ref[...] + jnp.sum(contrib, axis=0, keepdims=True)

    # ---- KL term, added once on the last tile (mu/logvar are resident) ----
    @pl.when(step == pl.num_programs(0) - 1)
    def _finalize():
        lv = jnp.minimum(logvar_ref[...], MAX_LOGVAR)              # clamp(max=10)
        kl_elem = 1.0 + lv - mu_ref[...] * mu_ref[...] - jnp.exp(lv)
        kl_tot = jnp.sum(jnp.sum(kl_elem, axis=1, keepdims=True),
                         axis=0, keepdims=True)                    # (1, 1)
        out_ref[...] = out_ref[...] + kl_scale * kl_tot


def vgae_loss(z, mu, logvar, pos_edge_index, neg_edge_index, *, edge_tile=512):
    """VGAE loss. z/mu/logvar: [N, D] f32, edge indices: [2, E] i32."""
    z = jnp.asarray(z, jnp.float32)
    mu = jnp.asarray(mu, jnp.float32)
    logvar = jnp.asarray(logvar, jnp.float32)

    n, d = z.shape
    e_pos = int(pos_edge_index.shape[1])
    e_neg = int(neg_edge_index.shape[1])
    e_total = e_pos + e_neg

    # Node embeddings, zero-padded to lane-aligned tiles; zero rows/cols
    # contribute nothing to the edge dot products.
    n_pad = _round_up(n, _LANES)        # also the one-hot contraction dim
    d_pad = _round_up(d, _LANES)
    z_pad = jnp.zeros((n_pad, d_pad), jnp.float32).at[:n, :d].set(z)

    # KL inputs in a lane-dense [rows, 128] layout (full sum is reshape-invariant);
    # zero padding contributes 1 + 0 - 0 - exp(0) = 0.
    flat = _round_up(n * d, _SUBLANES * _LANES)
    mu_dense = jnp.zeros((flat,), jnp.float32).at[: n * d].set(mu.reshape(-1))
    mu_dense = mu_dense.reshape(-1, _LANES)
    lv_dense = jnp.zeros((flat,), jnp.float32).at[: n * d].set(logvar.reshape(-1))
    lv_dense = lv_dense.reshape(-1, _LANES)

    # Positive + negative edges fused into one stream; the pos/neg choice is encoded
    # in the sign of a single per-edge weight whose magnitude is the 1/E mean factor.
    # Padded edges: index 0, weight 0 -> contribute 0.
    edge_tile = _round_up(max(_SUBLANES,
                              min(edge_tile, _round_up(e_total, _SUBLANES))),
                          _SUBLANES)
    e_pad = _round_up(e_total, edge_tile)
    n_tiles = e_pad // edge_tile

    idx_i = jnp.zeros((e_pad,), jnp.int32).at[:e_total].set(
        jnp.concatenate([pos_edge_index[0], neg_edge_index[0]]).astype(jnp.int32))
    idx_j = jnp.zeros((e_pad,), jnp.int32).at[:e_total].set(
        jnp.concatenate([pos_edge_index[1], neg_edge_index[1]]).astype(jnp.int32))
    w = (jnp.zeros((e_pad,), jnp.float32)
         .at[:e_pos].set(1.0 / e_pos)
         .at[e_pos:e_total].set(-1.0 / e_neg))

    idx_i = idx_i.reshape(e_pad, 1)
    idx_j = idx_j.reshape(e_pad, 1)
    w = w.reshape(e_pad, 1)

    kl_scale = -0.5 / float(n * n)      # (-1/2) * mean-over-rows, then / N
    kernel = functools.partial(_vgae_loss_kernel, kl_scale=kl_scale)

    def edge_spec():
        return pl.BlockSpec((edge_tile, 1), lambda t: (t, 0))

    def resident(shape):
        return pl.BlockSpec(shape, lambda t: (0, 0))

    cost = pl.CostEstimate(
        flops=4 * e_pad * n_pad * d_pad + 8 * e_pad * d_pad + 4 * flat,
        transcendentals=2 * e_pad + flat,
        bytes_accessed=4 * (n_pad * d_pad + 2 * flat + 3 * e_pad + 1),
    )

    out = pl.pallas_call(
        kernel,
        out_shape=jax.ShapeDtypeStruct((1, 1), jnp.float32),
        grid=(n_tiles,),
        in_specs=[
            edge_spec(),                     # idx_i
            edge_spec(),                     # idx_j
            edge_spec(),                     # w (signed, mean-weighted)
            resident((n_pad, d_pad)),        # z (VMEM-resident across tiles)
            resident(mu_dense.shape),        # mu  (lane-dense, resident)
            resident(lv_dense.shape),        # logvar (lane-dense, resident)
        ],
        out_specs=pl.BlockSpec((1, 1), lambda t: (0, 0)),
        compiler_params=pltpu.CompilerParams(
            dimension_semantics=("arbitrary",)),
        cost_estimate=cost,
    )(idx_i, idx_j, w, z_pad, mu_dense, lv_dense)
    return out[0, 0]


def _reference_loss(z, mu, logvar, pos_edge_index, neg_edge_index):
    """Plain-JAX reference mirroring the PyTorch module."""
    def dec(ei):
        return jax.nn.sigmoid(jnp.sum(z[ei[0]] * z[ei[1]], axis=1))

    pos_loss = -jnp.mean(jnp.log(dec(pos_edge_index) + EPS))
    neg_loss = -jnp.mean(jnp.log(1.0 - dec(neg_edge_index) + EPS))
    lv = jnp.minimum(logvar, MAX_LOGVAR)
    kl = -0.5 * jnp.mean(jnp.sum(1.0 + lv - mu ** 2 - jnp.exp(lv), axis=1))
    return pos_loss + neg_loss + kl / z.shape[0]


if __name__ == "__main__":
    key = jax.random.PRNGKey(0)
    k_z, k_mu, k_lv, k_pe, k_ne = jax.random.split(key, 5)

    N, D = 64, 32           # nodes, latent dim
    E_POS, E_NEG = 64, 128  # positive / negative edges

    z = jax.random.normal(k_z, (N, D), dtype=jnp.float32) * 0.5
    mu = jax.random.normal(k_mu, (N, D), dtype=jnp.float32) * 0.5
    logvar = jax.random.normal(k_lv, (N, D), dtype=jnp.float32) * 0.5
    pos_edge_index = jax.random.randint(k_pe, (2, E_POS), 0, N, dtype=jnp.int32)
    neg_edge_index = jax.random.randint(k_ne, (2, E_NEG), 0, N, dtype=jnp.int32)

    # edge_tile=128 -> 2 grid steps at these sizes, exercising the accumulator path.
    loss = vgae_loss(z, mu, logvar, pos_edge_index, neg_edge_index, edge_tile=128)
    loss = jax.block_until_ready(loss)

    ref = _reference_loss(z, mu, logvar, pos_edge_index, neg_edge_index)
    assert bool(jnp.isfinite(loss)), loss
    assert jnp.allclose(loss, ref, rtol=1e-4, atol=1e-4), (loss, ref)

    print("KERNEL_OK")
</pallas_src>

<mosaic_0001>
module attributes {stable_mosaic.version = 11 : i64} {
  func.func @_vgae_loss_kernel(%arg0: i32, %arg1: memref<128x1xi32, #tpu.memory_space<vmem>>, %arg2: memref<128x1xi32, #tpu.memory_space<vmem>>, %arg3: memref<128x1xf32, #tpu.memory_space<vmem>>, %arg4: memref<128x128xf32, #tpu.memory_space<vmem>>, %arg5: memref<16x128xf32, #tpu.memory_space<vmem>>, %arg6: memref<16x128xf32, #tpu.memory_space<vmem>>, %arg7: memref<1x1xf32, #tpu.memory_space<vmem>>) attributes {dimension_semantics = [#tpu.dimension_semantics<arbitrary>], iteration_bounds = array<i64: 2>, scalar_prefetch = 0 : i64, scratch_operands = 0 : i64, tpu.core_type = #tpu.core_type<tc>, window_params = [{transform_indices = @transform_0, window_bounds = array<i64: 128, 1>}, {transform_indices = @transform_1, window_bounds = array<i64: 128, 1>}, {transform_indices = @transform_2, window_bounds = array<i64: 128, 1>}, {pipeline_mode = #tpu.pipeline_mode<synchronous>, transform_indices = @transform_3, window_bounds = array<i64: 128, 128>}, {pipeline_mode = #tpu.pipeline_mode<synchronous>, transform_indices = @transform_4, window_bounds = array<i64: 16, 128>}, {pipeline_mode = #tpu.pipeline_mode<synchronous>, transform_indices = @transform_5, window_bounds = array<i64: 16, 128>}, {pipeline_mode = #tpu.pipeline_mode<synchronous>, transform_indices = @transform_6, window_bounds = array<i64: 1, 1>}]} {
    %c0_i32 = arith.constant 0 : i32
    %0 = arith.cmpi eq, %arg0, %c0_i32 : i32
    %1 = arith.extui %0 : i1 to i32
    %c0_i32_0 = arith.constant 0 : i32
    %2 = arith.cmpi ne, %1, %c0_i32_0 : i32
    scf.if %2 {
      %cst_21 = arith.constant 0.000000e+00 : f32
      %46 = vector.broadcast %cst_21 : f32 to vector<1x1xf32>
      %c0_22 = arith.constant 0 : index
      %c0_23 = arith.constant 0 : index
      %47 = vector.load %arg7[%c0_22, %c0_23] : memref<1x1xf32, #tpu.memory_space<vmem>>, vector<1x1xf32>
      tpu.vector_store %arg7[%c0_22, %c0_23], %46 {strides = array<i32>} : memref<1x1xf32, #tpu.memory_space<vmem>>, vector<1x1xf32>,
    } else {
    }
    %3 = tpu.iota {dimensions = array<i32: 1>} : vector<128x128xi32>
    %c0 = arith.constant 0 : index
    %c0_1 = arith.constant 0 : index
    %4 = vector.load %arg1[%c0, %c0_1] : memref<128x1xi32, #tpu.memory_space<vmem>>, vector<128x1xi32>
    %5 = vector.broadcast %4 : vector<128x1xi32> to vector<128x128xi32>
    %6 = arith.cmpi eq, %3, %5 : vector<128x128xi32>
    %7 = arith.extui %6 : vector<128x128xi1> to vector<128x128xi32>
    %8 = arith.sitofp %7 : vector<128x128xi32> to vector<128x128xf32>
    %c0_2 = arith.constant 0 : index
    %c0_3 = arith.constant 0 : index
    %9 = vector.load %arg2[%c0_2, %c0_3] : memref<128x1xi32, #tpu.memory_space<vmem>>, vector<128x1xi32>
    %10 = vector.broadcast %9 : vector<128x1xi32> to vector<128x128xi32>
    %11 = arith.cmpi eq, %3, %10 : vector<128x128xi32>
    %12 = arith.extui %11 : vector<128x128xi1> to vector<128x128xi32>
    %13 = arith.sitofp %12 : vector<128x128xi32> to vector<128x128xf32>
    %c0_4 = arith.constant 0 : index
    %c0_5 = arith.constant 0 : index
    %14 = vector.load %arg4[%c0_4, %c0_5] : memref<128x128xf32, #tpu.memory_space<vmem>>, vector<128x128xf32>
    %cst = arith.constant dense<0.000000e+00> : vector<128x128xf32>
    %15 = tpu.matmul %8, %14, %cst {dimension_numbers = #tpu.dot_dimension_numbers<[1], [0], [0], [1], [0, 0, 1, 1], [], []>, precision = #tpu.contract_precision<fp32>} : vector<128x128xf32>, vector<128x128xf32>, vector<128x128xf32> -> vector<128x128xf32>
    %cst_6 = arith.constant dense<0.000000e+00> : vector<128x128xf32>
    %16 = tpu.matmul %13, %14, %cst_6 {dimension_numbers = #tpu.dot_dimension_numbers<[1], [0], [0], [1], [0, 0, 1, 1], [], []>, precision = #tpu.contract_precision<fp32>} : vector<128x128xf32>, vector<128x128xf32>, vector<128x128xf32> -> vector<128x128xf32>
    %17 = arith.mulf %15, %16 : vector<128x128xf32>
    %cst_7 = arith.constant dense<0.000000e+00> : vector<128xf32>
    %18 = vector.multi_reduction <add>, %17, %cst_7 [1] : vector<128x128xf32> to vector<128xf32>
    %19 = vector.shape_cast %18 : vector<128xf32> to vector<128x1xf32>
    %20 = arith.negf %19 : vector<128x1xf32>
    %21 = math.exp %20 : vector<128x1xf32>
    %cst_8 = arith.constant 1.000000e+00 : f32
    %22 = vector.broadcast %cst_8 : f32 to vector<128x1xf32>
    %23 = arith.addf %22, %21 : vector<128x1xf32>
    %24 = arith.divf %22, %23 : vector<128x1xf32>
    %c0_9 = arith.constant 0 : index
    %c0_10 = arith.constant 0 : index
    %25 = vector.load %arg3[%c0_9, %c0_10] : memref<128x1xf32, #tpu.memory_space<vmem>>, vector<128x1xf32>
    %cst_11 = arith.constant 0.000000e+00 : f32
    %26 = vector.broadcast %cst_11 : f32 to vector<128x1xf32>
    %27 = arith.cmpf olt, %25, %26 : vector<128x1xf32>
    %cst_12 = arith.constant 1.000000e+00 : f32
    %28 = vector.broadcast %cst_12 : f32 to vector<128x1xf32>
    %29 = arith.subf %28, %24 : vector<128x1xf32>
    %30 = arith.select %27, %29, %24 : vector<128x1xi1>, vector<128x1xf32>
    %31 = math.absf %25 : vector<128x1xf32>
    %cst_13 = arith.constant 0.000000e+00 : f32
    %32 = vector.broadcast %cst_13 : f32 to vector<128x1xf32>
    %33 = arith.subf %32, %31 : vector<128x1xf32>
    %cst_14 = arith.constant 1.000000e-15 : f32
    %34 = vector.broadcast %cst_14 : f32 to vector<128x1xf32>
    %35 = arith.addf %30, %34 : vector<128x1xf32>
    %36 = math.log %35 : vector<128x1xf32>
    %37 = arith.mulf %33, %36 : vector<128x1xf32>
    %c0_15 = arith.constant 0 : index
    %c0_16 = arith.constant 0 : index
    %38 = vector.load %arg7[%c0_15, %c0_16] : memref<1x1xf32, #tpu.memory_space<vmem>>, vector<1x1xf32>
    %cst_17 = arith.constant dense<0.000000e+00> : vector<1xf32>
    %39 = vector.multi_reduction <add>, %37, %cst_17 [0] : vector<128x1xf32> to vector<1xf32>
    %40 = vector.shape_cast %39 : vector<1xf32> to vector<1x1xf32>
    %41 = arith.addf %38, %40 : vector<1x1xf32>
    %c0_18 = arith.constant 0 : index
    %c0_19 = arith.constant 0 : index
    %42 = vector.load %arg7[%c0_18, %c0_19] : memref<1x1xf32, #tpu.memory_space<vmem>>, vector<1x1xf32>
    tpu.vector_store %arg7[%c0_18, %c0_19], %41 {strides = array<i32>} : memref<1x1xf32, #tpu.memory_space<vmem>>, vector<1x1xf32>,
    %c1_i32 = arith.constant 1 : i32
    %43 = arith.cmpi eq, %arg0, %c1_i32 : i32
    %44 = arith.extui %43 : i1 to i32
    %c0_i32_20 = arith.constant 0 : i32
    %45 = arith.cmpi ne, %44, %c0_i32_20 : i32
    scf.if %45 {
      %c0_21 = arith.constant 0 : index
      %c0_22 = arith.constant 0 : index
      %46 = vector.load %arg6[%c0_21, %c0_22] : memref<16x128xf32, #tpu.memory_space<vmem>>, vector<16x128xf32>
      %cst_23 = arith.constant 1.000000e+01 : f32
      %47 = vector.broadcast %cst_23 : f32 to vector<16x128xf32>
      %48 = arith.minimumf %46, %47 : vector<16x128xf32>
      %cst_24 = arith.constant 1.000000e+00 : f32
      %49 = vector.broadcast %cst_24 : f32 to vector<16x128xf32>
      %50 = arith.addf %49, %48 : vector<16x128xf32>
      %c0_25 = arith.constant 0 : index
      %c0_26 = arith.constant 0 : index
      %51 = vector.load %arg5[%c0_25, %c0_26] : memref<16x128xf32, #tpu.memory_space<vmem>>, vector<16x128xf32>
      %c0_27 = arith.constant 0 : index
      %c0_28 = arith.constant 0 : index
      %52 = vector.load %arg5[%c0_27, %c0_28] : memref<16x128xf32, #tpu.memory_space<vmem>>, vector<16x128xf32>
      %53 = arith.mulf %51, %52 : vector<16x128xf32>
      %54 = arith.subf %50, %53 : vector<16x128xf32>
      %55 = math.exp %48 : vector<16x128xf32>
      %56 = arith.subf %54, %55 : vector<16x128xf32>
      %cst_29 = arith.constant dense<0.000000e+00> : vector<16xf32>
      %57 = vector.multi_reduction <add>, %56, %cst_29 [1] : vector<16x128xf32> to vector<16xf32>
      %58 = vector.shape_cast %57 : vector<16xf32> to vector<16x1xf32>
      %cst_30 = arith.constant dense<0.000000e+00> : vector<1xf32>
      %59 = vector.multi_reduction <add>, %58, %cst_30 [0] : vector<16x1xf32> to vector<1xf32>
      %60 = vector.shape_cast %59 : vector<1xf32> to vector<1x1xf32>
      %c0_31 = arith.constant 0 : index
      %c0_32 = arith.constant 0 : index
      %61 = vector.load %arg7[%c0_31, %c0_32] : memref<1x1xf32, #tpu.memory_space<vmem>>, vector<1x1xf32>
      %cst_33 = arith.constant -1.22070313E-4 : f32
      %62 = vector.broadcast %cst_33 : f32 to vector<1x1xf32>
      %63 = arith.mulf %62, %60 : vector<1x1xf32>
      %64 = arith.addf %61, %63 : vector<1x1xf32>
      %c0_34 = arith.constant 0 : index
      %c0_35 = arith.constant 0 : index
      %65 = vector.load %arg7[%c0_34, %c0_35] : memref<1x1xf32, #tpu.memory_space<vmem>>, vector<1x1xf32>
      tpu.vector_store %arg7[%c0_34, %c0_35], %64 {strides = array<i32>} : memref<1x1xf32, #tpu.memory_space<vmem>>, vector<1x1xf32>,
    } else {
    }
    return
  }
  func.func @transform_0(%arg0: i32) -> (i32, i32) {
    %c0_i32 = arith.constant 0 : i32
    %c0_i32_0 = arith.constant 0 : i32
    return %arg0, %c0_i32 : i32, i32
  }
  func.func @transform_1(%arg0: i32) -> (i32, i32) {
    %c0_i32 = arith.constant 0 : i32
    %c0_i32_0 = arith.constant 0 : i32
    return %arg0, %c0_i32 : i32, i32
  }
  func.func @transform_2(%arg0: i32) -> (i32, i32) {
    %c0_i32 = arith.constant 0 : i32
    %c0_i32_0 = arith.constant 0 : i32
    return %arg0, %c0_i32 : i32, i32
  }
  func.func @transform_3(%arg0: i32) -> (i32, i32) {
    %c0_i32 = arith.constant 0 : i32
    %c0_i32_0 = arith.constant 0 : i32
    %c0_i32_1 = arith.constant 0 : i32
    return %c0_i32, %c0_i32_0 : i32, i32
  }
  func.func @transform_4(%arg0: i32) -> (i32, i32) {
    %c0_i32 = arith.constant 0 : i32
    %c0_i32_0 = arith.constant 0 : i32
    %c0_i32_1 = arith.constant 0 : i32
    return %c0_i32, %c0_i32_0 : i32, i32
  }
  func.func @transform_5(%arg0: i32) -> (i32, i32) {
    %c0_i32 = arith.constant 0 : i32
    %c0_i32_0 = arith.constant 0 : i32
    %c0_i32_1 = arith.constant 0 : i32
    return %c0_i32, %c0_i32_0 : i32, i32
  }
  func.func @transform_6(%arg0: i32) -> (i32, i32) {
    %c0_i32 = arith.constant 0 : i32
    %c0_i32_0 = arith.constant 0 : i32
    %c0_i32_1 = arith.constant 0 : i32
    return %c0_i32, %c0_i32_0 : i32, i32
  }
}

</mosaic_0001>

<bundles_post_ra>
// kernel: tpu_custom_call.1
= control target key start
LH: loop header
LB: loop body
LE: loop exit
PB: predicated region body
PF: predicated region fallthrough
CT: control target
= control target key end

     0   :  { %11 = vsyncpa [#allocation3], 0  ;;  %s5516_s21 = smov 0   ;;  %s7186_s0 = inlined_call_operand.vmem [shape: s32[256,1], index: 0, kind: input, shape index: {}]   ;;  %s7187_s1 = inlined_call_operand.vmem [shape: s32[256,1], index: 1, kind: input, shape index: {}]   ;;  %s7188_s2 = inlined_call_operand.vmem [shape: f32[256,1], index: 2, kind: input, shape index: {}]   ;;  %s7189_s3 = inlined_call_operand.vmem [shape: f32[128,128], index: 3, kind: input, shape index: {}]   ;;  %s7190_s4 = inlined_call_operand.vmem [shape: f32[16,128], index: 4, kind: input, shape index: {}]   ;;  %s7191_s5 = inlined_call_operand.vmem [shape: f32[16,128], index: 5, kind: input, shape index: {}]   ;;  %s7192_s6 = inlined_call_operand.hbm [shape: f32[1,1], index: 6, kind: output, shape index: {}]  }
   0x1 LB: > { %s5522_s22 = sadd.s32 4294967295, %s5474_s21   ;;  %p3560_p0 = scmp.ge.s32.totalorder %s5474_s21, 1  ;;  %s5474_s21 = sphi %s5516_s21, %s17_s21  }
   0x2   : > { %p231_p1 = scmp.lt.s32.totalorder %s5474_s21, 3 }
   0x4   : > { %p232_p2 = pnand %p3560_p0, %p231_p1 }
   0x6   : > { %235 = sbr.rel (%p232_p2) target bundleno = 990 (0x3de), region = 44 }
   0xd   : > { %s3561_s23 = sshll.u32 %s5522_s22, 4  ;;  %p3567_p4 = scmp.ne.s32.totalorder %s5522_s22, 0 }
   0xe   : > { %p267_p3 = scmp.lt.s32.totalorder %s3561_s23, 31  ;;  %vm288_vm0 = vcmask (!%p3567_p4), 0   ;;  %v5476_v0 = vmov (!%p3567_p4), 0.0  }
   0xf   : > { %287 = sbr.rel (%p3567_p4) target bundleno = 22 (0x16), region = 48  ;;  %289 = vst.msk [vmem:[#allocation2] sm:$0x1] (!%p3567_p4), %vm288_vm0, %v5476_v0 }
  0x10   : > { %s7610_s23 = smov (!%p267_p3, %s3561_s23), 31 }
  0x11   : > { %s3562_s24 = sshll.u32 %s7610_s23, 3 }
  0x12   : > { %s5530_s27 = scalar_lea.vmem %s7186_s0, %s3562_s24  ;;  %s5535_s30 = scalar_lea.vmem %s7187_s1, %s3562_s24 }
  0x13   : > { %s5540_s9 = scalar_lea.vmem %s7188_s2, %s3562_s24 }
  0x16 PF: > { %v293_v1 = vld [vmem:[%s5530_s27 + $0x8] sm:$0xff]  ;;  %v292_v2 = vld [vmem:[%s5530_s27] sm:$0xff]  ;;  %v5477_v3 = vmov 0   ;;  %v406_v6 = vld [vmem:[%s5535_s30 + $0x10] sm:$0xff]  ;;  %p3712_p5 = scmp.ne.s32.totalorder %s5522_s22, 1 }
  0x17   : > { %5337 = vset.pattern.permute.xlu1 %v5477_v3  ;;  %5336 = vset.pattern.permute.xlu0 %v5477_v3  ;;  %v405_v4 = vld [vmem:[%s5535_s30 + $0x8] sm:$0xff]  ;;  %v404_v5 = vld [vmem:[%s5535_s30] sm:$0xff]  ;;  %v294_v7 = vld [vmem:[%s5530_s27 + $0x10] sm:$0xff] }
  0x18   : > { %312 = vperm.xlu1 %5337, %v293_v1   ;;  %309 = vperm.xlu0 %5336, %v292_v2   ;;  %v407_v8 = vld [vmem:[%s5535_s30 + $0x18] sm:$0xff]  ;;  %v5554_v10 = vld [vmem:[%s7189_s3] sm:$0xff]  ;;  %v5559_v11 = vld [vmem:[%s7189_s3 + $0x8] sm:$0xff] }
  0x19   : > { %v295_v9 = vld [vmem:[%s5530_s27 + $0x18] sm:$0xff]  ;;  %v533_v12 = vand.u32 4294901760, %v5554_v10  ;;  %v5565_v13 = vld [vmem:[%s7189_s3 + $0x10] sm:$0xff]  ;;  %v536_v15 = vand.u32 4294901760, %v5559_v11  ;;  %v5578_v18 = vld [vmem:[%s7189_s3 + $0x20] sm:$0xff] }
  0x1a   : > { %v5570_v14 = vld [vmem:[%s7189_s3 + $0x18] sm:$0xff]  ;;  %v539_v16 = vand.u32 4294901760, %v5565_v13  ;;  %v5583_v19 = vld [vmem:[%s7189_s3 + $0x28] sm:$0xff]  ;;  %v408_v21 = vld [vmem:[%s5535_s30 + $0x20] sm:$0xff]  ;;  %v545_v24 = vand.u32 4294901760, %v5578_v18 }
  0x1b   : > { %v542_v17 = vand.u32 4294901760, %v5570_v14  ;;  %v5589_v20 = vpack.c.bf16 %v536_v15, %v533_v12  ;;  %v296_v22 = vld [vmem:[%s5530_s27 + $0x20] sm:$0xff]  ;;  %v548_v25 = vand.u32 4294901760, %v5583_v19  ;;  %v5606_v26 = vld [vmem:[%s7189_s3 + $0x30] sm:$0xff]  ;;  %v5611_v27 = vld [vmem:[%s7189_s3 + $0x38] sm:$0xff]  ;;  %v5726_v61 = vsub.f32 %v5554_v10, %v533_v12 }
  0x1c   : > { %424 = vperm.xlu1 %5337, %v405_v4   ;;  %421 = vperm.xlu0 %5336, %v404_v5   ;;  %v409_v28 = vld [vmem:[%s5535_s30 + $0x28] sm:$0xff]  ;;  %v551_v31 = vand.u32 4294901760, %v5606_v26  ;;  %v554_v32 = vand.u32 4294901760, %v5611_v27  ;;  %v5630_v33 = vld [vmem:[%s7189_s3 + $0x40] sm:$0xff]  ;;  %v410_v35 = vld [vmem:[%s5535_s30 + $0x30] sm:$0xff]  ;;  %v5731_v62 = vsub.f32 %v5559_v11, %v536_v15 }
  0x1d   : > { %v5597_v23 = vpack.c.bf16 %v542_v17, %v539_v16  ;;  %4774 = vmatprep.subr.bf16.mxu0 %v5589_v20  ;;  %4966 = vmatprep.subr.bf16.mxu1 %v5589_v20  ;;  %v297_v29 = vld [vmem:[%s5530_s27 + $0x28] sm:$0xff]  ;;  %v5622_v30 = vpack.c.bf16 %v548_v25, %v545_v24  ;;  %v298_v36 = vld [vmem:[%s5530_s27 + $0x30] sm:$0xff]  ;;  %v557_v38 = vand.u32 4294901760, %v5630_v33  ;;  %v5659_v41 = vld [vmem:[%s7189_s3 + $0x58] sm:$0xff]  ;;  %7371 = vst [vmem:[#allocation11_spill] sm:$0xff] %v5726_v61  ;;  %v7210_v63 = vand.u32 4294901760, %v5726_v61 }
  0x1e   : > { %4776 = vmatpush3.bf16.msra.mxu0 %v5589_v20  ;;  %4968 = vmatpush3.bf16.msra.mxu1 %v5589_v20  ;;  %v5635_v34 = vld [vmem:[%s7189_s3 + $0x48] sm:$0xff]  ;;  %v5646_v37 = vpack.c.bf16 %v554_v32, %v551_v31  ;;  %v5654_v40 = vld [vmem:[%s7189_s3 + $0x50] sm:$0xff]  ;;  %v411_v42 = vld [vmem:[%s5535_s30 + $0x38] sm:$0xff]  ;;  %v566_v46 = vand.u32 4294901760, %v5659_v41  ;;  %7372 = vst [vmem:[#allocation12_spill] sm:$0xff] %v5731_v62  ;;  %v7209_v0 = vand.u32 4294901760, %v5731_v62 }
  0x1f   : > { %7365 = vst [vmem:[#allocation5_spill] sm:$0xff] %v5597_v23  ;;  %4778 = vmatprep.subr.bf16.mxu0 %v5597_v23  ;;  %7366 = vst [vmem:[#allocation6_spill] sm:$0xff] %v5622_v30  ;;  %4970 = vmatprep.subr.bf16.mxu1 %v5597_v23  ;;  %v560_v39 = vand.u32 4294901760, %v5635_v34  ;;  %v299_v43 = vld [vmem:[%s5530_s27 + $0x38] sm:$0xff]  ;;  %v563_v45 = vand.u32 4294901760, %v5654_v40  ;;  %v5678_v47 = vld [vmem:[%s7189_s3 + $0x60] sm:$0xff]  ;;  %v777_v4 = vsub.f32 %v5726_v61, %v7210_v63 }
  0x20   : > { %427 = vperm.xlu1 %5337, %v406_v6   ;;  %315 = vperm.xlu0 %5336, %v294_v7   ;;  %7367 = vst [vmem:[#allocation7_spill] sm:$0xff] %v5646_v37  ;;  %v5683_v48 = vld [vmem:[%s7189_s3 + $0x68] sm:$0xff]  ;;  %v412_v49 = vld [vmem:[%s5535_s30 + $0x40] sm:$0xff]  ;;  %v569_v52 = vand.u32 4294901760, %v5678_v47  ;;  %v5702_v54 = vld [vmem:[%s7189_s3 + $0x70] sm:$0xff]  ;;  %v784_v5 = vsub.f32 %v5731_v62, %v7209_v0  ;;  %v5756_v6 = vsub.f32 %v5565_v13, %v539_v16 }
  0x21   : > { %v5670_v44 = vpack.c.bf16 %v560_v39, %v557_v38  ;;  %v300_v50 = vld [vmem:[%s5530_s27 + $0x40] sm:$0xff]  ;;  %v5694_v51 = vpack.c.bf16 %v566_v46, %v563_v45  ;;  %v572_v53 = vand.u32 4294901760, %v5683_v48  ;;  %v5707_v55 = vld [vmem:[%s7189_s3 + $0x78] sm:$0xff]  ;;  %v575_v56 = vand.u32 4294901760, %v5702_v54  ;;  %v413_v58 = vld [vmem:[%s5535_s30 + $0x48] sm:$0xff] }
  0x22   : > { %4780 = vmatpush3.bf16.msra.mxu0 %v5597_v23  ;;  %4972 = vmatpush3.bf16.msra.mxu1 %v5597_v23  ;;  %v578_v57 = vand.u32 4294901760, %v5707_v55  ;;  %v301_v59 = vld [vmem:[%s5530_s27 + $0x48] sm:$0xff]  ;;  %v414_v2 = vld [vmem:[%s5535_s30 + $0x50] sm:$0xff]  ;;  %7374 = vst [vmem:[#allocation14_spill] sm:$0xff] %v5756_v6  ;;  %v5761_v7 = vsub.f32 %v5570_v14, %v542_v17  ;;  %v7207_v10 = vand.u32 4294901760, %v5756_v6  ;;  %v415_v12 = vld [vmem:[%s5535_s30 + $0x58] sm:$0xff]  ;;  %v5779_v16 = vsub.f32 %v5578_v18, %v545_v24 }
  0x23   : > { %4782 = vmatprep.subr.bf16.mxu0 %v5622_v30  ;;  %4974 = vmatprep.subr.bf16.mxu1 %v5622_v30  ;;  %7368 = vst [vmem:[#allocation8_spill] sm:$0xff] %v5670_v44  ;;  %7369 = vst [vmem:[#allocation9_spill] sm:$0xff] %v5694_v51  ;;  %v5720_v60 = vpack.c.bf16 %v572_v53, %v569_v52  ;;  %v302_v3 = vld [vmem:[%s5530_s27 + $0x50] sm:$0xff]  ;;  %v303_v13 = vld [vmem:[%s5530_s27 + $0x58] sm:$0xff] }
  0x24   : > { %430 = vperm.xlu1 %5337, %v407_v8   ;;  %318 = vperm.xlu0 %5336, %v295_v9   ;;  %v5741_v1 = vpack.c.bf16 %v578_v57, %v575_v56  ;;  %7375 = vst [vmem:[#allocation15_spill] sm:$0xff] %v5761_v7  ;;  %v778_v8 = vand.u32 4294901760, %v777_v4  ;;  %v785_v9 = vand.u32 4294901760, %v784_v5  ;;  %v7206_v11 = vand.u32 4294901760, %v5761_v7  ;;  %7376 = vst [vmem:[#allocation16_spill] sm:$0xff] %v5779_v16 }
  0x25   : > { %7370 = vst [vmem:[#allocation10_spill] sm:$0xff] %v5720_v60  ;;  %v791_v15 = vsub.f32 %v5756_v6, %v7207_v10 }
  0x26   : > { %4784 = vmatpush3.bf16.msra.mxu0 %v5622_v30  ;;  %4976 = vmatpush3.bf16.msra.mxu1 %v5622_v30  ;;  %7373 = vst [vmem:[#allocation13_spill] sm:$0xff] %v5741_v1  ;;  %v5771_v14 = vpack.c.bf16 %v785_v9, %v778_v8  ;;  %v798_v17 = vsub.f32 %v5761_v7, %v7206_v11 }
  0x27   : > { %4786 = vmatprep.subr.bf16.mxu0 %v5646_v37  ;;  %4978 = vmatprep.subr.bf16.mxu1 %v5646_v37 }
  0x28   : > { %433 = vperm.xlu1 %5337, %v408_v21   ;;  %321 = vperm.xlu0 %5336, %v296_v22   ;;  %v5787_v21 = vsub.f32 %v5583_v19, %v548_v25  ;;  %v792_v22 = vand.u32 4294901760, %v791_v15  ;;  %v799_v18 = vand.u32 4294901760, %v798_v17  ;;  %v5803_v25 = vsub.f32 %v5606_v26, %v551_v31  ;;  %v417_v31 = vld [vmem:[%s5535_s30 + $0x68] sm:$0xff] }
  0x29   : > { %v5852_v15 = vsub.f32 %v5654_v40, %v563_v45  ;;  %v5857_v17 = vsub.f32 %v5659_v41, %v566_v46  ;;  %v5871_v41 = vsub.f32 %v5678_v47, %v569_v52  ;;  %v5876_v45 = vsub.f32 %v5683_v48, %v572_v53 }
  0x2a   : > { %4788 = vmatpush3.bf16.msra.mxu0 %v5646_v37  ;;  %4980 = vmatpush3.bf16.msra.mxu1 %v5646_v37  ;;  %7377 = vst [vmem:[#allocation17_spill] sm:$0xff] %v5787_v21  ;;  %v7203_v24 = vand.u32 4294901760, %v5787_v21  ;;  %7378 = vst [vmem:[#allocation18_spill] sm:$0xff] %v5803_v25  ;;  %v5892_v52 = vsub.f32 %v5702_v54, %v575_v56  ;;  %v5897_v53 = vsub.f32 %v5707_v55, %v578_v57 }
  0x2b   : > { %4790 = vmatprep.subr.bf16.mxu0 %v5670_v44  ;;  %4982 = vmatprep.subr.bf16.mxu1 %v5670_v44  ;;  %7382 = vst [vmem:[#allocation22_spill] sm:$0xff] %v5852_v15  ;;  %7383 = vst [vmem:[#allocation23_spill] sm:$0xff] %v5857_v17 }
  0x2c   : > { %436 = vperm.xlu1 %5337, %v409_v28   ;;  %324 = vperm.xlu0 %5336, %v297_v29   ;;  %v7204_v28 = vand.u32 4294901760, %v5779_v16  ;;  %v416_v29 = vld [vmem:[%s5535_s30 + $0x60] sm:$0xff]  ;;  %7384 = vst [vmem:[#allocation24_spill] sm:$0xff] %v5871_v41  ;;  %7385 = vst [vmem:[#allocation25_spill] sm:$0xff] %v5876_v45 }
  0x2d   : > { %7386 = vst [vmem:[#allocation26_spill] sm:$0xff] %v5892_v52  ;;  %7387 = vst [vmem:[#allocation27_spill] sm:$0xff] %v5897_v53 }
  0x2e   : > { %4792 = vmatpush3.bf16.msra.mxu0 %v5670_v44  ;;  %4984 = vmatpush3.bf16.msra.mxu1 %v5670_v44  ;;  %v805_v19 = vsub.f32 %v5779_v16, %v7204_v28 }
  0x2f   : > { %4794 = vmatprep.subr.bf16.mxu0 %v5694_v51  ;;  %4986 = vmatprep.subr.bf16.mxu1 %v5694_v51 }
  0x30   : > { %439 = vperm.xlu1 %5337, %v410_v35   ;;  %327 = vperm.xlu0 %5336, %v298_v36   ;;  %v304_v35 = vld [vmem:[%s5530_s27 + $0x60] sm:$0xff]  ;;  %v5808_v36 = vsub.f32 %v5611_v27, %v554_v32 }
  0x32   : > { %4796 = vmatpush3.bf16.msra.mxu0 %v5694_v51  ;;  %4988 = vmatpush3.bf16.msra.mxu1 %v5694_v51  ;;  %7379 = vst [vmem:[#allocation19_spill] sm:$0xff] %v5808_v36 }
  0x33   : > { %4798 = vmatprep.subr.bf16.mxu0 %v5720_v60  ;;  %4990 = vmatprep.subr.bf16.mxu1 %v5720_v60 }
  0x34   : > { %442 = vperm.xlu1 %5337, %v411_v42   ;;  %330 = vperm.xlu0 %5336, %v299_v43   ;;  %v5810_v42 = vpack.c.bf16 %v799_v18, %v792_v22  ;;  %v812_v43 = vsub.f32 %v5787_v21, %v7203_v24 }
  0x36   : > { %4800 = vmatpush3.bf16.msra.mxu0 %v5720_v60  ;;  %4992 = vmatpush3.bf16.msra.mxu1 %v5720_v60  ;;  %v813_v26 = vand.u32 4294901760, %v812_v43  ;;  %v307_v43 = vld [vmem:[%s5530_s27 + $0x78] sm:$0xff] }
  0x37   : > { %4802 = vmatprep.subr.bf16.mxu0 %v5741_v1  ;;  %4994 = vmatprep.subr.bf16.mxu1 %v5741_v1 }
  0x38   : > { %445 = vperm.xlu1 %5337, %v412_v49   ;;  %333 = vperm.xlu0 %5336, %v300_v50   ;;  %v806_v49 = vand.u32 4294901760, %v805_v19  ;;  %v7202_v50 = vand.u32 4294901760, %v5803_v25  ;;  %v419_v19 = vld [vmem:[%s5535_s30 + $0x78] sm:$0xff] }
  0x3a   : > { %4804 = vmatpush3.bf16.msra.mxu0 %v5741_v1  ;;  %4996 = vmatpush3.bf16.msra.mxu1 %v5741_v1  ;;  %v819_v27 = vsub.f32 %v5803_v25, %v7202_v50  ;;  %v5835_v4 = vpack.c.bf16 %v813_v26, %v806_v49 }
  0x3b   : > { %4806 = vmatprep.subr.bf16.mxu0 %v5771_v14  ;;  %4998 = vmatprep.subr.bf16.mxu1 %v5771_v14 }
  0x3c   : > { %448 = vperm.xlu1 %5337, %v413_v58   ;;  %336 = vperm.xlu0 %5336, %v301_v59   ;;  %v7201_v58 = vand.u32 4294901760, %v5808_v36  ;;  %v305_v59 = vld [vmem:[%s5530_s27 + $0x68] sm:$0xff]  ;;  %v820_v5 = vand.u32 4294901760, %v819_v27 }
  0x3e   : > { %v826_v32 = vsub.f32 %v5808_v36, %v7201_v58 }
  0x40   : > { %451 = vperm.xlu1 %5337, %v414_v2   ;;  %339 = vperm.xlu0 %5336, %v302_v3   ;;  %v5828_v2 = vsub.f32 %v5630_v33, %v557_v38  ;;  %v5833_v3 = vsub.f32 %v5635_v34, %v560_v39  ;;  %v827_v8 = vand.u32 4294901760, %v826_v32  ;;  %v306_v33 = vld [vmem:[%s5530_s27 + $0x70] sm:$0xff] }
  0x42   : > { %7380 = vst [vmem:[#allocation20_spill] sm:$0xff] %v5828_v2  ;;  %7381 = vst [vmem:[#allocation21_spill] sm:$0xff] %v5833_v3  ;;  %v7200_v9 = vand.u32 4294901760, %v5828_v2  ;;  %v5841_v38 = vpack.c.bf16 %v827_v8, %v820_v5 }
  0x44   : > { %454 = vperm.xlu1 %5337, %v415_v12   ;;  %342 = vperm.xlu0 %5336, %v303_v13   ;;  %v7199_v12 = vand.u32 4294901760, %v5833_v3  ;;  %v418_v13 = vld [vmem:[%s5535_s30 + $0x70] sm:$0xff]  ;;  %v833_v34 = vsub.f32 %v5828_v2, %v7200_v9 }
  0x46   : > { %v840_v39 = vsub.f32 %v5833_v3, %v7199_v12  ;;  %v834_v22 = vand.u32 4294901760, %v833_v34 }
  0x48   : > { %457 = vperm.xlu1 %5337, %v416_v29   ;;  %345 = vperm.xlu0 %5336, %v304_v35   ;;  %v841_v18 = vand.u32 4294901760, %v840_v39  ;;  %v7198_v29 = vand.u32 4294901760, %v5852_v15  ;;  %v7197_v35 = vand.u32 4294901760, %v5857_v17 }
  0x4a   : > { %v5863_v49 = vpack.c.bf16 %v841_v18, %v834_v22  ;;  %v847_v40 = vsub.f32 %v5852_v15, %v7198_v29  ;;  %v854_v46 = vsub.f32 %v5857_v17, %v7197_v35  ;;  %v5915_v22 = vpack.c.bf16 %v5731_v62, %v5726_v61 }
  0x4b   : > { %v5919_v18 = vpack.c.bf16 %v5761_v7, %v5756_v6 }
  0x4c   : > { %460 = vperm.xlu1 %5337, %v417_v31   ;;  %348 = vperm.xlu0 %5336, %v305_v59   ;;  %v848_v26 = vand.u32 4294901760, %v847_v40  ;;  %v7196_v31 = vand.u32 4294901760, %v5871_v41  ;;  %v7195_v59 = vand.u32 4294901760, %v5876_v45  ;;  %v855_v27 = vand.u32 4294901760, %v854_v46 }
  0x4d   : > { %v5931_v40 = vpack.c.bf16 %v5833_v3, %v5828_v2  ;;  %v5935_v46 = vpack.c.bf16 %v5857_v17, %v5852_v15 }
  0x4e   : > { %v861_v47 = vsub.f32 %v5871_v41, %v7196_v31  ;;  %v868_v48 = vsub.f32 %v5876_v45, %v7195_v59  ;;  %v5899_v32 = vpack.c.bf16 %v855_v27, %v848_v26  ;;  %v5939_v26 = vpack.c.bf16 %v5876_v45, %v5871_v41 }
  0x4f   : > { %v5943_v27 = vpack.c.bf16 %v5897_v53, %v5892_v52 }
  0x50   : > { %463 = vperm.xlu1 %5337, %v418_v13   ;;  %351 = vperm.xlu0 %5336, %v306_v33   ;;  %v862_v5 = vand.u32 4294901760, %v861_v47  ;;  %v869_v8 = vand.u32 4294901760, %v868_v48  ;;  %v7194_v13 = vand.u32 4294901760, %v5892_v52  ;;  %v7193_v33 = vand.u32 4294901760, %v5897_v53 }
  0x51   : > { %v290_v47 = vlaneseq }
  0x52   : > { %v5903_v34 = vpack.c.bf16 %v869_v8, %v862_v5  ;;  %v875_v54 = vsub.f32 %v5892_v52, %v7194_v13  ;;  %v882_v56 = vsub.f32 %v5897_v53, %v7193_v33 }
  0x53   : > { %v5945_v48 = vand.u32 127, %v290_v47 }
  0x54   : > { %466 = vperm.xlu1 %5337, %v419_v19   ;;  %354 = vperm.xlu0 %5336, %v307_v43   ;;  %v876_v55 = vand.u32 4294901760, %v875_v54  ;;  %v883_v57 = vand.u32 4294901760, %v882_v56  ;;  %v5923_v19 = vpack.c.bf16 %v5787_v21, %v5779_v16  ;;  %v5927_v43 = vpack.c.bf16 %v5808_v36, %v5803_v25 }
  0x55   : > { %v7218_v54 = vmov 0.0  }
  0x56   : > { %v5911_v39 = vpack.c.bf16 %v883_v57, %v876_v55 }
  0x97   : > { %v5947_v5 = vpop.permute.xlu1 %312  ;;  %v5949_v8 = vpop.permute.xlu0 %309 }
  0x98   : > { %vm357_vm1 = vcmp.eq.s32.totalorder %v5945_v48, %v5947_v5  ;;  %vm356_vm2 = vcmp.eq.s32.totalorder %v5945_v48, %v5949_v8 }
  0x99   : > { %v3569_v56 = vsel %vm357_vm1, 1.0, %v7218_v54  ;;  %v3568_v55 = vsel %vm356_vm2, 1.0, %v7218_v54 }
  0x9a   : > { %v5963_v57 = vsub.f32 %v3569_v56, %v3569_v56  ;;  %v5965_v47 = vsub.f32 %v3568_v55, %v3568_v55 }
  0x9b   : > { %v5967_v33 = vpop.permute.xlu1 %424  ;;  %v5969_v13 = vpop.permute.xlu0 %421 }
  0x9c   : > { %vm469_vm3 = vcmp.eq.s32.totalorder %v5945_v48, %v5967_v33  ;;  %vm468_vm4 = vcmp.eq.s32.totalorder %v5945_v48, %v5969_v13  ;;  %v7208_v59 = vand.u32 4294901760, %v5965_v47  ;;  %v7205_v31 = vand.u32 4294901760, %v5963_v57 }
  0x9d   : > { %v3585_v56 = vsel %vm469_vm3, 1.0, %v7218_v54  ;;  %v3584_v55 = vsel %vm468_vm4, 1.0, %v7218_v54 }
  0x9e   : > { %v5985_v35 = vsub.f32 %v3585_v56, %v3585_v56  ;;  %v5987_v29 = vsub.f32 %v3584_v55, %v3584_v55  ;;  %v616_v12 = vsub.f32 %v5965_v47, %v7208_v59  ;;  %v626_v9 = vsub.f32 %v5963_v57, %v7205_v31 }
  0x9f   : > { %v5995_v58 = vpop.permute.xlu1 %427  ;;  %v5997_v50 = vpop.permute.xlu0 %315 }
  0xa0   : > { %vm470_vm5 = vcmp.eq.s32.totalorder %v5945_v48, %v5995_v58  ;;  %vm358_vm6 = vcmp.eq.s32.totalorder %v5945_v48, %v5997_v50  ;;  %v617_v56 = vand.u32 4294901760, %v616_v12  ;;  %v627_v55 = vand.u32 4294901760, %v626_v9 }
  0xa1   : > { %v3586_v24 = vsel %vm470_vm5, 1.0, %v7218_v54  ;;  %v3570_v28 = vsel %vm358_vm6, 1.0, %v7218_v54  ;;  %v7212_v31 = vand.u32 4294901760, %v5987_v29  ;;  %v7211_v11 = vand.u32 4294901760, %v5985_v35 }
  0xa2   : > { %v6013_v10 = vsub.f32 %v3586_v24, %v3586_v24  ;;  %v6015_v59 = vsub.f32 %v3570_v28, %v3570_v28  ;;  %4133 = vmatprep.mubr.f32.mxu0 %v617_v56 }
  0xa3   : > { %v6017_v9 = vpop.permute.xlu1 %430  ;;  %v6019_v12 = vpop.permute.xlu0 %318  ;;  %4134 = vmatmul.mubr.f32.vlgmr.msra.gmra.mrb[0].mxu0 %v627_v55  ;;  %v1902_v0 = vsub.f32 %v5987_v29, %v7212_v31  ;;  %v1912_v63 = vsub.f32 %v5985_v35, %v7211_v11 }
  0xa4   : > { %7388 = vst [vmem:[#allocation28_spill] sm:$0xff] %v6013_v10  ;;  %vm471_vm7 = vcmp.eq.s32.totalorder %v5945_v48, %v6017_v9  ;;  %vm359_vm8 = vcmp.eq.s32.totalorder %v5945_v48, %v6019_v12  ;;  %4808 = vmatpush3.bf16.msra.mxu0 %v5771_v14  ;;  %v7391_v24 = vand.u32 4294901760, %v6015_v59  ;;  %v7392_v45 = vand.u32 4294901760, %v6013_v10 }
  0xa5   : > { %v3587_v56 = vsel %vm471_vm7, 1.0, %v7218_v54  ;;  %v3571_v55 = vsel %vm359_vm8, 1.0, %v7218_v54  ;;  %v1903_v11 = vand.u32 4294901760, %v1902_v0  ;;  %v1913_v31 = vand.u32 4294901760, %v1912_v63  ;;  %4810 = vmatprep.subr.bf16.mxu0 %v5810_v42 }
  0xa6   : > { %v6043_v53 = vsub.f32 %v3587_v56, %v3587_v56  ;;  %v6045_v28 = vsub.f32 %v3571_v55, %v3571_v55  ;;  %v636_v52 = vsub.f32 %v6015_v59, %v7391_v24  ;;  %v1922_v41 = vsub.f32 %v6013_v10, %v7392_v45 }
  0xa7   : > { %4469 = vmatprep.mubr.f32.mxu1 %v1903_v11  ;;  %v6053_v17 = vpop.permute.xlu1 %433  ;;  %v6055_v54 = vpop.permute.xlu0 %321  ;;  %v7393_v24 = vmov 0.0  }
  0xa8   : > { %7389 = vst [vmem:[#allocation29_spill] sm:$0xff] %v6043_v53  ;;  %7390 = vst [vmem:[#allocation30_spill] sm:$0xff] %v6045_v28  ;;  %vm472_vm9 = vcmp.eq.s32.totalorder %v5945_v48, %v6053_v17  ;;  %vm360_vm10 = vcmp.eq.s32.totalorder %v5945_v48, %v6055_v54  ;;  %4470 = vmatmul.mubr.f32.vlgmr.msra.gmra.mrb[0].mxu1 %v1913_v31  ;;  %v637_v63 = vand.u32 4294901760, %v636_v52  ;;  %v1923_v0 = vand.u32 4294901760, %v1922_v41 }
  0xa9   : > { %4812 = vmatpush3.bf16.msra.mxu0 %v5810_v42  ;;  %v3588_v11 = vsel %vm472_vm9, 1.0, %v7393_v24  ;;  %v3572_v45 = vsel %vm360_vm10, 1.0, %v7393_v24  ;;  %v7223_v56 = vand.u32 4294901760, %v6045_v28  ;;  %v7222_v55 = vand.u32 4294901760, %v6043_v53  ;;  %5000 = vmatpush3.bf16.msra.mxu1 %v5771_v14 }
  0xaa   : > { %4814 = vmatprep.subr.bf16.mxu0 %v5835_v4  ;;  %v6074_v41 = vsub.f32 %v3588_v11, %v3588_v11  ;;  %v6076_v31 = vsub.f32 %v3572_v45, %v3572_v45  ;;  %4136 = vmatprep.mubr.f32.mxu0 %v637_v63 }
  0xab   : > { %4472 = vmatprep.mubr.f32.mxu1 %v1923_v0  ;;  %v6078_v52 = vpop.permute.xlu1 %436  ;;  %v6080_v15 = vpop.permute.xlu0 %324  ;;  %v646_v3 = vsub.f32 %v6045_v28, %v7223_v56  ;;  %v1932_v14 = vsub.f32 %v6043_v53, %v7222_v55  ;;  %5002 = vmatprep.subr.bf16.mxu1 %v5810_v42 }
  0xac   : > { %7394 = vst [vmem:[#allocation31_spill] sm:$0xff] %v6074_v41  ;;  %7395 = vst [vmem:[#allocation32_spill] sm:$0xff] %v6076_v31  ;;  %vm7321_vm11 = vcmp.eq.s32.totalorder %v5945_v48, %v6078_v52  ;;  %vm7322_vm12 = vcmp.eq.s32.totalorder %v5945_v48, %v6080_v15  ;;  %v7398_v2 = vand.u32 4294901760, %v6076_v31  ;;  %v7399_v25 = vand.u32 4294901760, %v6074_v41 }
  0xad   : > { %4816 = vmatpush3.bf16.msra.mxu0 %v5835_v4  ;;  %v3589_v11 = vsel %vm7321_vm11, 1.0, %v7393_v24  ;;  %v3573_v45 = vsel %vm7322_vm12, 1.0, %v7393_v24  ;;  %v647_v55 = vand.u32 4294901760, %v646_v3  ;;  %v1933_v56 = vand.u32 4294901760, %v1932_v14  ;;  %5004 = vmatpush3.bf16.msra.mxu1 %v5810_v42 }
  0xae   : > { %4818 = vmatprep.subr.bf16.mxu0 %v5841_v38  ;;  %v6106_v63 = vsub.f32 %v3589_v11, %v3589_v11  ;;  %v6108_v0 = vsub.f32 %v3573_v45, %v3573_v45  ;;  %v656_v36 = vsub.f32 %v6076_v31, %v7398_v2  ;;  %v1942_v21 = vsub.f32 %v6074_v41, %v7399_v25 }
  0xaf   : > { %5006 = vmatprep.subr.bf16.mxu1 %v5835_v4  ;;  %4137 = vmatmul.mubr.f32.gmra.mrb[2].mxu0 %v647_v55  ;;  %v6117_v3 = vpop.permute.xlu1 %439  ;;  %v6119_v42 = vpop.permute.xlu0 %327 }
  0xb0   : > { %7396 = vst [vmem:[#allocation33_spill] sm:$0xff] %v6106_v63  ;;  %7397 = vst [vmem:[#allocation34_spill] sm:$0xff] %v6108_v0  ;;  %4473 = vmatmul.mubr.f32.gmra.mrb[2].mxu1 %v1933_v56  ;;  %vm7323_vm13 = vcmp.eq.s32.totalorder %v5945_v48, %v6117_v3  ;;  %vm7324_vm14 = vcmp.eq.s32.totalorder %v5945_v48, %v6119_v42  ;;  %v657_v14 = vand.u32 4294901760, %v656_v36  ;;  %v1943_v2 = vand.u32 4294901760, %v1942_v21 }
  0xb1   : > { %4820 = vmatpush3.bf16.msra.mxu0 %v5841_v38  ;;  %v3590_v25 = vsel %vm7323_vm13, 1.0, %v7393_v24  ;;  %v3574_v56 = vsel %vm7324_vm14, 1.0, %v7393_v24  ;;  %v7231_v55 = vand.u32 4294901760, %v6108_v0  ;;  %v7230_v11 = vand.u32 4294901760, %v6106_v63  ;;  %5008 = vmatpush3.bf16.msra.mxu1 %v5835_v4 }
  0xb2   : > { %4822 = vmatprep.subr.bf16.mxu0 %v5863_v49  ;;  %v6138_v21 = vsub.f32 %v3590_v25, %v3590_v25  ;;  %v6140_v36 = vsub.f32 %v3574_v56, %v3574_v56  ;;  %4139 = vmatprep.mubr.f32.mxu0 %v657_v14 }
  0xb3   : > { %4475 = vmatprep.mubr.f32.mxu1 %v1943_v2  ;;  %v6142_v45 = vpop.permute.xlu1 %442  ;;  %v6144_v16 = vpop.permute.xlu0 %330  ;;  %v666_v7 = vsub.f32 %v6108_v0, %v7231_v55  ;;  %v1952_v4 = vsub.f32 %v6106_v63, %v7230_v11  ;;  %5010 = vmatprep.subr.bf16.mxu1 %v5841_v38 }
  0xb4   : > { %7400 = vst [vmem:[#allocation35_spill] sm:$0xff] %v6138_v21  ;;  %7401 = vst [vmem:[#allocation36_spill] sm:$0xff] %v6140_v36  ;;  %vm7237_vm15 = vcmp.eq.s32.totalorder %v5945_v48, %v6142_v45  ;;  %vm7238_vm0 = vcmp.eq.s32.totalorder %v5945_v48, %v6144_v16  ;;  %v7404_v6 = vand.u32 4294901760, %v6140_v36  ;;  %v7405_v61 = vand.u32 4294901760, %v6138_v21 }
  0xb5   : > { %4824 = vmatpush3.bf16.msra.mxu0 %v5863_v49  ;;  %v3591_v25 = vsel %vm7237_vm15, 1.0, %v7393_v24  ;;  %v3575_v56 = vsel %vm7238_vm0, 1.0, %v7393_v24  ;;  %v667_v11 = vand.u32 4294901760, %v666_v7  ;;  %v1953_v55 = vand.u32 4294901760, %v1952_v4  ;;  %5012 = vmatpush3.bf16.msra.mxu1 %v5841_v38 }
  0xb6   : > { %4826 = vmatprep.subr.bf16.mxu0 %v5899_v32  ;;  %v6170_v14 = vsub.f32 %v3591_v25, %v3591_v25  ;;  %v6172_v2 = vsub.f32 %v3575_v56, %v3575_v56  ;;  %v676_v62 = vsub.f32 %v6140_v36, %v7404_v6  ;;  %v1962_v1 = vsub.f32 %v6138_v21, %v7405_v61 }
  0xb7   : > { %5014 = vmatprep.subr.bf16.mxu1 %v5863_v49  ;;  %4140 = vmatmul.mubr.f32.gmra.mrb[4].mxu0 %v667_v11  ;;  %v6181_v7 = vpop.permute.xlu1 %445  ;;  %v6183_v38 = vpop.permute.xlu0 %333 }
  0xb8   : > { %7402 = vst [vmem:[#allocation37_spill] sm:$0xff] %v6170_v14  ;;  %7403 = vst [vmem:[#allocation38_spill] sm:$0xff] %v6172_v2  ;;  %4476 = vmatmul.mubr.f32.gmra.mrb[4].mxu1 %v1953_v55  ;;  %vm7243_vm15 = vcmp.eq.s32.totalorder %v5945_v48, %v6181_v7  ;;  %vm7244_vm0 = vcmp.eq.s32.totalorder %v5945_v48, %v6183_v38  ;;  %v677_v4 = vand.u32 4294901760, %v676_v62  ;;  %v1963_v6 = vand.u32 4294901760, %v1962_v1 }
  0xb9   : > { %7406 = vst [vmem:[#allocation39_spill] sm:$0xff] %v6181_v7  ;;  %7407 = vst [vmem:[#allocation40_spill] sm:$0xff] %v6183_v38  ;;  %4828 = vmatpush3.bf16.msra.mxu0 %v5899_v32  ;;  %v3592_v61 = vsel %vm7243_vm15, 1.0, %v7393_v24  ;;  %v3576_v55 = vsel %vm7244_vm0, 1.0, %v7393_v24  ;;  %v7246_v11 = vand.u32 4294901760, %v6172_v2  ;;  %v7245_v25 = vand.u32 4294901760, %v6170_v14  ;;  %5016 = vmatpush3.bf16.msra.mxu1 %v5863_v49 }
  0xba   : > { %4830 = vmatprep.subr.bf16.mxu0 %v5903_v34  ;;  %v6202_v62 = vsub.f32 %v3592_v61, %v3592_v61  ;;  %v6204_v1 = vsub.f32 %v3576_v55, %v3576_v55  ;;  %4142 = vmatprep.mubr.f32.mxu0 %v677_v4 }
  0xbb   : > { %4478 = vmatprep.mubr.f32.mxu1 %v1963_v6  ;;  %v6206_v56 = vpop.permute.xlu1 %448  ;;  %v6208_v60 = vpop.permute.xlu0 %336  ;;  %v686_v51 = vsub.f32 %v6172_v2, %v7246_v11  ;;  %v1972_v49 = vsub.f32 %v6170_v14, %v7245_v25  ;;  %5018 = vmatprep.subr.bf16.mxu1 %v5899_v32 }
  0xbc   : > { %7408 = vst [vmem:[#allocation41_spill] sm:$0xff] %v6202_v62  ;;  %7409 = vst [vmem:[#allocation42_spill] sm:$0xff] %v6204_v1  ;;  %vm7255_vm15 = vcmp.eq.s32.totalorder %v5945_v48, %v6206_v56  ;;  %vm7256_vm0 = vcmp.eq.s32.totalorder %v5945_v48, %v6208_v60  ;;  %v7414_v44 = vand.u32 4294901760, %v6204_v1  ;;  %v7415_v2 = vand.u32 4294901760, %v6202_v62 }
  0xbd   : > { %7410 = vst [vmem:[#allocation43_spill] sm:$0xff] %v6206_v56  ;;  %7411 = vst [vmem:[#allocation44_spill] sm:$0xff] %v6208_v60  ;;  %4832 = vmatpush3.bf16.msra.mxu0 %v5903_v34  ;;  %v3593_v61 = vsel %vm7255_vm15, 1.0, %v7393_v24  ;;  %v3577_v55 = vsel %vm7256_vm0, 1.0, %v7393_v24  ;;  %v687_v25 = vand.u32 4294901760, %v686_v51  ;;  %v1973_v11 = vand.u32 4294901760, %v1972_v49  ;;  %5020 = vmatpush3.bf16.msra.mxu1 %v5899_v32 }
  0xbe   : > { %4834 = vmatprep.subr.bf16.mxu0 %v5911_v39  ;;  %v6234_v4 = vsub.f32 %v3593_v61, %v3593_v61  ;;  %v6236_v6 = vsub.f32 %v3577_v55, %v3577_v55  ;;  %v696_v14 = vsub.f32 %v6204_v1, %v7414_v44  ;;  %v1982_v37 = vsub.f32 %v6202_v62, %v7415_v2 }
  0xbf   : > { %5022 = vmatprep.subr.bf16.mxu1 %v5903_v34  ;;  %4143 = vmatmul.mubr.f32.gmra.mrb[6].mxu0 %v687_v25  ;;  %v6245_v51 = vpop.permute.xlu1 %451  ;;  %v6247_v32 = vpop.permute.xlu0 %339 }
  0xc0   : > { %7412 = vst [vmem:[#allocation45_spill] sm:$0xff] %v6234_v4  ;;  %7413 = vst [vmem:[#allocation46_spill] sm:$0xff] %v6236_v6  ;;  %4479 = vmatmul.mubr.f32.gmra.mrb[6].mxu1 %v1973_v11  ;;  %vm7261_vm15 = vcmp.eq.s32.totalorder %v5945_v48, %v6245_v51  ;;  %vm7262_vm0 = vcmp.eq.s32.totalorder %v5945_v48, %v6247_v32  ;;  %v697_v49 = vand.u32 4294901760, %v696_v14  ;;  %v1983_v44 = vand.u32 4294901760, %v1982_v37 }
  0xc1   : > { %7416 = vst [vmem:[#allocation47_spill] sm:$0xff] %v6245_v51  ;;  %7417 = vst [vmem:[#allocation48_spill] sm:$0xff] %v6247_v32  ;;  %4836 = vmatpush3.bf16.msra.mxu0 %v5911_v39  ;;  %v3594_v2 = vsel %vm7261_vm15, 1.0, %v7393_v24  ;;  %v3578_v11 = vsel %vm7262_vm0, 1.0, %v7393_v24  ;;  %v7264_v25 = vand.u32 4294901760, %v6236_v6  ;;  %v7263_v61 = vand.u32 4294901760, %v6234_v4  ;;  %5024 = vmatpush3.bf16.msra.mxu1 %v5903_v34 }
  0xc2   : > { %4838 = vmatprep.subr.bf16.mxu0 %v5915_v22  ;;  %v6266_v37 = vsub.f32 %v3594_v2, %v3594_v2  ;;  %v6268_v14 = vsub.f32 %v3578_v11, %v3578_v11  ;;  %4145 = vmatprep.mubr.f32.mxu0 %v697_v49 }
  0xc3   : > { %4481 = vmatprep.mubr.f32.mxu1 %v1983_v44  ;;  %v6270_v55 = vpop.permute.xlu1 %454  ;;  %v6272_v62 = vpop.permute.xlu0 %342  ;;  %v706_v1 = vsub.f32 %v6236_v6, %v7264_v25  ;;  %v1992_v34 = vsub.f32 %v6234_v4, %v7263_v61  ;;  %5026 = vmatprep.subr.bf16.mxu1 %v5911_v39 }
  0xc4   : > { %7418 = vst [vmem:[#allocation49_spill] sm:$0xff] %v6266_v37  ;;  %7419 = vst [vmem:[#allocation50_spill] sm:$0xff] %v6268_v14  ;;  %vm7273_vm15 = vcmp.eq.s32.totalorder %v5945_v48, %v6270_v55  ;;  %vm7274_vm0 = vcmp.eq.s32.totalorder %v5945_v48, %v6272_v62  ;;  %v7275_v49 = vand.u32 4294901760, %v6268_v14  ;;  %v7424_v21 = vand.u32 4294901760, %v6266_v37 }
  0xc5   : > { %7420 = vst [vmem:[#allocation51_spill] sm:$0xff] %v6270_v55  ;;  %7421 = vst [vmem:[#allocation52_spill] sm:$0xff] %v6272_v62  ;;  %v3595_v2 = vsel %vm7273_vm15, 1.0, %v7393_v24  ;;  %v3579_v11 = vsel %vm7274_vm0, 1.0, %v7393_v24  ;;  %v707_v61 = vand.u32 4294901760, %v706_v1  ;;  %v1993_v25 = vand.u32 4294901760, %v1992_v34  ;;  %5028 = vmatpush3.bf16.msra.mxu1 %v5911_v39 }
  0xc6   : > { %v6296_v4 = vsub.f32 %v3595_v2, %v3595_v2  ;;  %v6298_v6 = vsub.f32 %v3579_v11, %v3579_v11  ;;  %v716_v44 = vsub.f32 %v6268_v14, %v7275_v49  ;;  %v2002_v36 = vsub.f32 %v6266_v37, %v7424_v21  ;;  %5030 = vmatprep.subr.bf16.mxu1 %v5915_v22 }
  0xc7   : > { %4146 = vmatmul.mubr.f32.gmra.mrb[8].mxu0 %v707_v61  ;;  %4482 = vmatmul.mubr.f32.gmra.mrb[8].mxu1 %v1993_v25  ;;  %v6307_v1 = vpop.permute.xlu1 %457  ;;  %v6309_v34 = vpop.permute.xlu0 %345 }
  0xc8   : > { %7422 = vst [vmem:[#allocation53_spill] sm:$0xff] %v6296_v4  ;;  %7423 = vst [vmem:[#allocation54_spill] sm:$0xff] %v6298_v6  ;;  %vm7282_vm15 = vcmp.eq.s32.totalorder %v5945_v48, %v6307_v1  ;;  %vm7283_vm0 = vcmp.eq.s32.totalorder %v5945_v48, %v6309_v34  ;;  %v717_v39 = vand.u32 4294901760, %v716_v44  ;;  %v2003_v2 = vand.u32 4294901760, %v2002_v36 }
  0xc9   : > { %7425 = vst [vmem:[#allocation55_spill] sm:$0xff] %v6307_v1  ;;  %7426 = vst [vmem:[#allocation56_spill] sm:$0xff] %v6309_v34  ;;  %v3596_v21 = vsel %vm7282_vm15, 1.0, %v7393_v24  ;;  %v3580_v25 = vsel %vm7283_vm0, 1.0, %v7393_v24  ;;  %v7285_v61 = vand.u32 4294901760, %v6298_v6  ;;  %v7284_v11 = vand.u32 4294901760, %v6296_v4 }
  0xca   : > { %v6325_v49 = vsub.f32 %v3596_v21, %v3596_v21  ;;  %v6327_v37 = vsub.f32 %v3580_v25, %v3580_v25  ;;  %4148 = vmatprep.mubr.f32.mxu0 %v717_v39  ;;  %4484 = vmatprep.mubr.f32.mxu1 %v2003_v2 }
  0xcb   : > { %v6329_v36 = vpop.permute.xlu1 %460  ;;  %v6331_v44 = vpop.permute.xlu0 %348  ;;  %v726_v14 = vsub.f32 %v6298_v6, %v7285_v61  ;;  %v2012_v63 = vsub.f32 %v6296_v4, %v7284_v11 }
  0xcc   : > { %7427 = vst [vmem:[#allocation57_spill] sm:$0xff] %v6325_v49  ;;  %7428 = vst [vmem:[#allocation58_spill] sm:$0xff] %v6327_v37  ;;  %vm7298_vm15 = vcmp.eq.s32.totalorder %v5945_v48, %v6329_v36  ;;  %vm7299_vm0 = vcmp.eq.s32.totalorder %v5945_v48, %v6331_v44  ;;  %v7300_v39 = vand.u32 4294901760, %v6327_v37  ;;  %v7433_v0 = vand.u32 4294901760, %v6325_v49 }
  0xcd   : > { %7429 = vst [vmem:[#allocation59_spill] sm:$0xff] %v6329_v36  ;;  %7430 = vst [vmem:[#allocation60_spill] sm:$0xff] %v6331_v44  ;;  %v3597_v21 = vsel %vm7298_vm15, 1.0, %v7393_v24  ;;  %v3581_v25 = vsel %vm7299_vm0, 1.0, %v7393_v24  ;;  %v727_v11 = vand.u32 4294901760, %v726_v14  ;;  %v2013_v61 = vand.u32 4294901760, %v2012_v63 }
  0xce   : > { %v6353_v4 = vsub.f32 %v3597_v21, %v3597_v21  ;;  %v6355_v6 = vsub.f32 %v3581_v25, %v3581_v25  ;;  %v736_v2 = vsub.f32 %v6327_v37, %v7300_v39  ;;  %v2022_v30 = vsub.f32 %v6325_v49, %v7433_v0 }
  0xcf   : > { %4149 = vmatmul.mubr.f32.gmra.mrb[10].mxu0 %v727_v11  ;;  %4485 = vmatmul.mubr.f32.gmra.mrb[10].mxu1 %v2013_v61  ;;  %v6363_v41 = vpop.permute.xlu1 %463  ;;  %v6365_v31 = vpop.permute.xlu0 %351 }
  0xd0   : > { %7431 = vst [vmem:[#allocation61_spill] sm:$0xff] %v6353_v4  ;;  %7432 = vst [vmem:[#allocation62_spill] sm:$0xff] %v6355_v6  ;;  %vm7305_vm15 = vcmp.eq.s32.totalorder %v5945_v48, %v6363_v41  ;;  %vm7306_vm0 = vcmp.eq.s32.totalorder %v5945_v48, %v6365_v31  ;;  %v737_v63 = vand.u32 4294901760, %v736_v2  ;;  %v2023_v14 = vand.u32 4294901760, %v2022_v30 }
  0xd1   : > { %7434 = vst [vmem:[#allocation63_spill] sm:$0xff] %v6363_v41  ;;  %7435 = vst [vmem:[#allocation64_spill] sm:$0xff] %v6365_v31  ;;  %v3598_v21 = vsel %vm7305_vm15, 1.0, %v7393_v24  ;;  %v3582_v0 = vsel %vm7306_vm0, 1.0, %v7393_v24  ;;  %v7308_v61 = vand.u32 4294901760, %v6355_v6  ;;  %v7307_v11 = vand.u32 4294901760, %v6353_v4 }
  0xd2   : > { %v6381_v25 = vsub.f32 %v3598_v21, %v3598_v21  ;;  %v6383_v39 = vsub.f32 %v3582_v0, %v3582_v0  ;;  %4151 = vmatprep.mubr.f32.mxu0 %v737_v63  ;;  %4487 = vmatprep.mubr.f32.mxu1 %v2023_v14 }
  0xd3   : > { %v6385_v30 = vpop.permute.xlu1 %466  ;;  %v6387_v2 = vpop.permute.xlu0 %354  ;;  %v746_v49 = vsub.f32 %v6355_v6, %v7308_v61  ;;  %v2032_v37 = vsub.f32 %v6353_v4, %v7307_v11 }
  0xd4   : > { %7436 = vst [vmem:[#allocation65_spill] sm:$0xff] %v6385_v30  ;;  %7437 = vst [vmem:[#allocation66_spill] sm:$0xff] %v6387_v2  ;;  %vm483_vm15 = vcmp.eq.s32.totalorder %v5945_v48, %v6385_v30  ;;  %vm371_vm0 = vcmp.eq.s32.totalorder %v5945_v48, %v6387_v2  ;;  %v7329_v63 = vand.u32 4294901760, %v6383_v39  ;;  %v7438_v53 = vand.u32 4294901760, %v6381_v25  ;;  %v7476_v30 = vld [vmem:[#allocation9_spill] sm:$0xff]  ;;  %v7477_v2 = vld [vmem:[#allocation54_spill] sm:$0xff] }
  0xd5   : > { %v3599_v21 = vsel %vm483_vm15, 1.0, %v7393_v24  ;;  %v3583_v0 = vsel %vm371_vm0, 1.0, %v7393_v24  ;;  %v747_v11 = vand.u32 4294901760, %v746_v49  ;;  %v2033_v61 = vand.u32 4294901760, %v2032_v37 }
  0xd6   : > { %v6409_v4 = vsub.f32 %v3599_v21, %v3599_v21  ;;  %v6411_v6 = vsub.f32 %v3583_v0, %v3583_v0  ;;  %v756_v14 = vsub.f32 %v6383_v39, %v7329_v63  ;;  %v2042_v28 = vsub.f32 %v6381_v25, %v7438_v53  ;;  %v7475_v63 = vld [vmem:[#allocation49_spill] sm:$0xff] }
  0xd7   : > { %4152 = vmatmul.mubr.f32.gmra.mrb[12].mxu0 %v747_v11  ;;  %4488 = vmatmul.mubr.f32.gmra.mrb[12].mxu1 %v2033_v61  ;;  %v7325_v61 = vmov 1.0   ;;  %v7466_v11 = vld [vmem:[#allocation7_spill] sm:$0xff] }
  0xd8   : > { %v757_v23 = vand.u32 4294901760, %v756_v14  ;;  %v2043_v10 = vand.u32 4294901760, %v2042_v28  ;;  %v7328_v24 = vand.u32 4294901760, %v6411_v6  ;;  %v7327_v37 = vand.u32 4294901760, %v6409_v4  ;;  %v7465_v28 = vld [vmem:[#allocation35_spill] sm:$0xff]  ;;  %v7467_v14 = vld [vmem:[#allocation38_spill] sm:$0xff] }
  0xda   : > { %4154 = vmatprep.mubr.f32.mxu0 %v757_v23  ;;  %4490 = vmatprep.mubr.f32.mxu1 %v2043_v10  ;;  %v766_v49 = vsub.f32 %v6411_v6, %v7328_v24  ;;  %v2052_v21 = vsub.f32 %v6409_v4, %v7327_v37  ;;  %v7455_v23 = vld [vmem:[#allocation28_spill] sm:$0xff]  ;;  %v7456_v10 = vld [vmem:[#allocation5_spill] sm:$0xff]  ;;  %v7474_v24 = vld [vmem:[#allocation50_spill] sm:$0xff] }
  0xdb   : > { %v7473_v37 = vld [vmem:[#allocation45_spill] sm:$0xff] }
  0xdc   : > { %v767_v0 = vand.u32 4294901760, %v766_v49  ;;  %v2053_v53 = vand.u32 4294901760, %v2052_v21  ;;  %v7468_v49 = vld [vmem:[#allocation37_spill] sm:$0xff]  ;;  %v7469_v21 = vld [vmem:[#allocation42_spill] sm:$0xff] }
  0xde   : > { %4155 = vmatmul.mubr.f32.gmra.mrb[14].mxu0 %v767_v0  ;;  %4491 = vmatmul.mubr.f32.gmra.mrb[14].mxu1 %v2053_v53  ;;  %v7470_v0 = vld [vmem:[#allocation41_spill] sm:$0xff]  ;;  %v7471_v53 = vld [vmem:[#allocation8_spill] sm:$0xff] }
  0xdf   : > { %4189 = vmatprep.mubr.msk.f32.mxu0 %vm356_vm2, %v7325_v61  ;;  %4525 = vmatprep.mubr.msk.f32.mxu1 %vm468_vm4, %v7325_v61 }
  0xe2   : > { %4190 = vmatmul.mubr.msk.f32.vlgmr.msra.gmra.mrb[0].mxu0 %vm357_vm1, %v7325_v61  ;;  %4526 = vmatmul.mubr.msk.f32.vlgmr.msra.gmra.mrb[0].mxu1 %vm469_vm3, %v7325_v61 }
  0xe3   : > { %4840 = vmatpush3.bf16.msra.mxu0 %v5915_v22  ;;  %5032 = vmatpush3.bf16.msra.mxu1 %v5915_v22  ;;  %v7457_v22 = vld [vmem:[#allocation30_spill] sm:$0xff] }
  0xe4   : > { %4192 = vmatprep.mubr.msk.f32.mxu0 %vm358_vm6, %v7325_v61  ;;  %4528 = vmatprep.mubr.msk.f32.mxu1 %vm470_vm5, %v7325_v61 }
  0xe5   : > { %4842 = vmatprep.subr.bf16.mxu0 %v5919_v18  ;;  %5034 = vmatprep.subr.bf16.mxu1 %v5919_v18 }
  0xe6   : > { %4193 = vmatmul.mubr.msk.f32.gmra.mrb[2].mxu0 %vm359_vm8, %v7325_v61  ;;  %4529 = vmatmul.mubr.msk.f32.gmra.mrb[2].mxu1 %vm471_vm7, %v7325_v61 }
  0xe7   : > { %4844 = vmatpush3.bf16.msra.mxu0 %v5919_v18  ;;  %5036 = vmatpush3.bf16.msra.mxu1 %v5919_v18  ;;  %v7458_v18 = vld [vmem:[#allocation29_spill] sm:$0xff] }
  0xe8   : > { %4195 = vmatprep.mubr.msk.f32.mxu0 %vm360_vm10, %v7325_v61  ;;  %4531 = vmatprep.mubr.msk.f32.mxu1 %vm472_vm9, %v7325_v61 }
  0xe9   : > { %4846 = vmatprep.subr.bf16.mxu0 %v5923_v19  ;;  %5038 = vmatprep.subr.bf16.mxu1 %v5923_v19 }
  0xea   : > { %4196 = vmatmul.mubr.msk.f32.gmra.mrb[4].mxu0 %vm7322_vm12, %v7325_v61  ;;  %4532 = vmatmul.mubr.msk.f32.gmra.mrb[4].mxu1 %vm7321_vm11, %v7325_v61  ;;  %vm7439_vm11 = vcmp.eq.s32.totalorder %v5945_v48, %v6144_v16  ;;  %vm7440_vm12 = vcmp.eq.s32.totalorder %v5945_v48, %v6142_v45 }
  0xeb   : > { %4848 = vmatpush3.bf16.msra.mxu0 %v5923_v19  ;;  %5040 = vmatpush3.bf16.msra.mxu1 %v5923_v19  ;;  %v7459_v19 = vld [vmem:[#allocation32_spill] sm:$0xff] }
  0xec   : > { %4198 = vmatprep.mubr.msk.f32.mxu0 %vm7324_vm14, %v7325_v61  ;;  %4534 = vmatprep.mubr.msk.f32.mxu1 %vm7323_vm13, %v7325_v61  ;;  %vm7441_vm13 = vcmp.eq.s32.totalorder %v5945_v48, %v6183_v38  ;;  %vm7442_vm14 = vcmp.eq.s32.totalorder %v5945_v48, %v6181_v7  ;;  %v7495_v7 = vand.u32 4294901760, %v5963_v57  ;;  %v7496_v38 = vand.u32 4294901760, %v5985_v35 }
  0xed   : > { %4850 = vmatprep.subr.bf16.mxu0 %v5927_v43  ;;  %5042 = vmatprep.subr.bf16.mxu1 %v5927_v43 }
  0xee   : > { %4199 = vmatmul.mubr.msk.f32.gmra.mrb[6].mxu0 %vm7439_vm11, %v7325_v61  ;;  %4535 = vmatmul.mubr.msk.f32.gmra.mrb[6].mxu1 %vm7440_vm12, %v7325_v61  ;;  %vm7443_vm11 = vcmp.eq.s32.totalorder %v5945_v48, %v6208_v60  ;;  %vm7444_vm12 = vcmp.eq.s32.totalorder %v5945_v48, %v6206_v56  ;;  %v7490_v60 = vand.u32 4294901760, %v5987_v29 }
  0xef   : > { %4852 = vmatpush3.bf16.msra.mxu0 %v5927_v43  ;;  %5044 = vmatpush3.bf16.msra.mxu1 %v5927_v43  ;;  %v7460_v43 = vld [vmem:[#allocation31_spill] sm:$0xff] }
  0xf0   : > { %4201 = vmatprep.mubr.msk.f32.mxu0 %vm7441_vm13, %v7325_v61  ;;  %4537 = vmatprep.mubr.msk.f32.mxu1 %vm7442_vm14, %v7325_v61  ;;  %vm7445_vm13 = vcmp.eq.s32.totalorder %v5945_v48, %v6247_v32  ;;  %vm7446_vm14 = vcmp.eq.s32.totalorder %v5945_v48, %v6245_v51  ;;  %v7487_v51 = vld [vmem:[#allocation12_spill] sm:$0xff] }
  0xf1   : > { %4854 = vmatprep.subr.bf16.mxu0 %v5931_v40  ;;  %5046 = vmatprep.subr.bf16.mxu1 %v5931_v40  ;;  %v7488_v32 = vand.u32 4294901760, %v7487_v51  ;;  %v7493_v51 = vld [vmem:[#allocation15_spill] sm:$0xff] }
  0xf2   : > { %4202 = vmatmul.mubr.msk.f32.gmra.mrb[8].mxu0 %vm7443_vm11, %v7325_v61  ;;  %4538 = vmatmul.mubr.msk.f32.gmra.mrb[8].mxu1 %vm7444_vm12, %v7325_v61  ;;  %vm7447_vm11 = vcmp.eq.s32.totalorder %v5945_v48, %v6272_v62  ;;  %vm7448_vm12 = vcmp.eq.s32.totalorder %v5945_v48, %v6270_v55  ;;  %v7484_v55 = vld [vmem:[#allocation13_spill] sm:$0xff]  ;;  %v7485_v62 = vld [vmem:[#allocation11_spill] sm:$0xff] }
  0xf3   : > { %4856 = vmatpush3.bf16.msra.mxu0 %v5931_v40  ;;  %5048 = vmatpush3.bf16.msra.mxu1 %v5931_v40  ;;  %v7461_v40 = vld [vmem:[#allocation6_spill] sm:$0xff] }
  0xf4   : > { %4204 = vmatprep.mubr.msk.f32.mxu0 %vm7445_vm13, %v7325_v61  ;;  %4540 = vmatprep.mubr.msk.f32.mxu1 %vm7446_vm14, %v7325_v61  ;;  %vm7449_vm13 = vcmp.eq.s32.totalorder %v5945_v48, %v6309_v34  ;;  %vm7450_vm14 = vcmp.eq.s32.totalorder %v5945_v48, %v6307_v1  ;;  %v7482_v1 = vld [vmem:[#allocation62_spill] sm:$0xff]  ;;  %v7483_v34 = vld [vmem:[#allocation61_spill] sm:$0xff] }
  0xf5   : > { %4858 = vmatprep.subr.bf16.mxu0 %v5935_v46  ;;  %5050 = vmatprep.subr.bf16.mxu1 %v5935_v46 }
  0xf6   : > { %4205 = vmatmul.mubr.msk.f32.gmra.mrb[10].mxu0 %vm7447_vm11, %v7325_v61  ;;  %4541 = vmatmul.mubr.msk.f32.gmra.mrb[10].mxu1 %vm7448_vm12, %v7325_v61  ;;  %vm7451_vm11 = vcmp.eq.s32.totalorder %v5945_v48, %v6331_v44  ;;  %vm7452_vm12 = vcmp.eq.s32.totalorder %v5945_v48, %v6329_v36  ;;  %v7480_v36 = vld [vmem:[#allocation57_spill] sm:$0xff]  ;;  %v7481_v44 = vld [vmem:[#allocation10_spill] sm:$0xff] }
  0xf7   : > { %4860 = vmatpush3.bf16.msra.mxu0 %v5935_v46  ;;  %5052 = vmatpush3.bf16.msra.mxu1 %v5935_v46  ;;  %v7462_v46 = vld [vmem:[#allocation34_spill] sm:$0xff] }
  0xf8   : > { %4207 = vmatprep.mubr.msk.f32.mxu0 %vm7449_vm13, %v7325_v61  ;;  %4543 = vmatprep.mubr.msk.f32.mxu1 %vm7450_vm14, %v7325_v61  ;;  %vm7453_vm13 = vcmp.eq.s32.totalorder %v5945_v48, %v6365_v31  ;;  %vm7454_vm14 = vcmp.eq.s32.totalorder %v5945_v48, %v6363_v41  ;;  %v7478_v41 = vld [vmem:[#allocation53_spill] sm:$0xff]  ;;  %v7479_v31 = vld [vmem:[#allocation58_spill] sm:$0xff] }
  0xf9   : > { %4862 = vmatprep.subr.bf16.mxu0 %v5939_v26  ;;  %5054 = vmatprep.subr.bf16.mxu1 %v5939_v26 }
  0xfa   : > { %4208 = vmatmul.mubr.msk.f32.gmra.mrb[12].mxu0 %vm7451_vm11, %v7325_v61  ;;  %4544 = vmatmul.mubr.msk.f32.gmra.mrb[12].mxu1 %vm7452_vm12, %v7325_v61  ;;  %vm7550_vm11 = vcmp.eq.s32.totalorder %v5945_v48, %v6080_v15  ;;  %vm7551_vm12 = vcmp.eq.s32.totalorder %v5945_v48, %v6078_v52 }
  0xfb   : > { %4864 = vmatpush3.bf16.msra.mxu0 %v5939_v26  ;;  %5056 = vmatpush3.bf16.msra.mxu1 %v5939_v26  ;;  %v7463_v26 = vld [vmem:[#allocation33_spill] sm:$0xff] }
  0xfc   : > { %4210 = vmatprep.mubr.msk.f32.mxu0 %vm7453_vm13, %v7325_v61  ;;  %4546 = vmatprep.mubr.msk.f32.mxu1 %vm7454_vm14, %v7325_v61  ;;  %vm7552_vm13 = vcmp.eq.s32.totalorder %v5945_v48, %v6119_v42  ;;  %vm7553_vm14 = vcmp.eq.s32.totalorder %v5945_v48, %v6117_v3 }
  0xfd   : > { %4866 = vmatprep.subr.bf16.mxu0 %v5943_v27  ;;  %5058 = vmatprep.subr.bf16.mxu1 %v5943_v27 }
  0xfe   : > { %4211 = vmatmul.mubr.msk.f32.gmra.mrb[14].mxu0 %vm371_vm0, %v7325_v61  ;;  %4547 = vmatmul.mubr.msk.f32.gmra.mrb[14].mxu1 %vm483_vm15, %v7325_v61  ;;  %v7472_v61 = vld [vmem:[#allocation46_spill] sm:$0xff] }
  0xff   : > { %4868 = vmatpush3.bf16.msra.mxu0 %v5943_v27  ;;  %5060 = vmatpush3.bf16.msra.mxu1 %v5943_v27  ;;  %v7464_v27 = vld [vmem:[#allocation36_spill] sm:$0xff] }
 0x100   : > { %4245 = vmatprep.mubr.f32.mxu0 %v5965_v47  ;;  %4581 = vmatprep.mubr.f32.mxu1 %v5987_v29  ;;  %v7499_v29 = vld [vmem:[#allocation16_spill] sm:$0xff] }
 0x101   : > { %4870 = vmatprep.subr.bf16.mxu0 %v5589_v20  ;;  %5062 = vmatprep.subr.bf16.mxu1 %v5589_v20 }
 0x102   : > { %4246 = vmatmul.mubr.f32.vlgmr.msra.gmra.mrb[0].mxu0 %v5963_v57  ;;  %4582 = vmatmul.mubr.f32.vlgmr.msra.gmra.mrb[0].mxu1 %v5985_v35  ;;  %v7503_v57 = vand.u32 4294901760, %v7457_v22  ;;  %v7504_v35 = vand.u32 4294901760, %v7458_v18 }
 0x103   : > { %4872 = vmatpush3.bf16.msra.mxu0 %v5589_v20  ;;  %5064 = vmatpush3.bf16.msra.mxu1 %v5589_v20 }
 0x104   : > { %4248 = vmatprep.mubr.f32.mxu0 %v6015_v59  ;;  %4584 = vmatprep.mubr.f32.mxu1 %v7455_v23 }
 0x105   : > { %4874 = vmatprep.subr.bf16.mxu0 %v7456_v10  ;;  %5066 = vmatprep.subr.bf16.mxu1 %v7456_v10 }
 0x106   : > { %4249 = vmatmul.mubr.f32.gmra.mrb[2].mxu0 %v7457_v22  ;;  %4585 = vmatmul.mubr.f32.gmra.mrb[2].mxu1 %v7458_v18  ;;  %v7511_v22 = vand.u32 4294901760, %v7462_v46  ;;  %v7512_v18 = vand.u32 4294901760, %v7463_v26 }
 0x107   : > { %4876 = vmatpush3.bf16.msra.mxu0 %v7456_v10  ;;  %5068 = vmatpush3.bf16.msra.mxu1 %v7456_v10 }
 0x108   : > { %4251 = vmatprep.mubr.f32.mxu0 %v7459_v19  ;;  %4587 = vmatprep.mubr.f32.mxu1 %v7460_v43 }
 0x109   : > { %4878 = vmatprep.subr.bf16.mxu0 %v7461_v40  ;;  %5070 = vmatprep.subr.bf16.mxu1 %v7461_v40 }
 0x10a   : > { %4252 = vmatmul.mubr.f32.gmra.mrb[4].mxu0 %v7462_v46  ;;  %4588 = vmatmul.mubr.f32.gmra.mrb[4].mxu1 %v7463_v26  ;;  %v7519_v46 = vand.u32 4294901760, %v7467_v14  ;;  %v7520_v26 = vand.u32 4294901760, %v7468_v49 }
 0x10b   : > { %4880 = vmatpush3.bf16.msra.mxu0 %v7461_v40  ;;  %5072 = vmatpush3.bf16.msra.mxu1 %v7461_v40 }
 0x10c   : > { %4254 = vmatprep.mubr.f32.mxu0 %v7464_v27  ;;  %4590 = vmatprep.mubr.f32.mxu1 %v7465_v28 }
 0x10d   : > { %4882 = vmatprep.subr.bf16.mxu0 %v7466_v11  ;;  %5074 = vmatprep.subr.bf16.mxu1 %v7466_v11 }
 0x10e   : > { %4255 = vmatmul.mubr.f32.gmra.mrb[6].mxu0 %v7467_v14  ;;  %4591 = vmatmul.mubr.f32.gmra.mrb[6].mxu1 %v7468_v49  ;;  %v7527_v14 = vand.u32 4294901760, %v7472_v61  ;;  %v7528_v49 = vand.u32 4294901760, %v7473_v37 }
 0x10f   : > { %4884 = vmatpush3.bf16.msra.mxu0 %v7466_v11  ;;  %5076 = vmatpush3.bf16.msra.mxu1 %v7466_v11 }
 0x110   : > { %4257 = vmatprep.mubr.f32.mxu0 %v7469_v21  ;;  %4593 = vmatprep.mubr.f32.mxu1 %v7470_v0 }
 0x111   : > { %4886 = vmatprep.subr.bf16.mxu0 %v7471_v53  ;;  %5078 = vmatprep.subr.bf16.mxu1 %v7471_v53 }
 0x112   : > { %4258 = vmatmul.mubr.f32.gmra.mrb[8].mxu0 %v7472_v61  ;;  %4594 = vmatmul.mubr.f32.gmra.mrb[8].mxu1 %v7473_v37  ;;  %v7535_v61 = vand.u32 4294901760, %v7477_v2  ;;  %v7536_v37 = vand.u32 4294901760, %v7478_v41 }
 0x113   : > { %4888 = vmatpush3.bf16.msra.mxu0 %v7471_v53  ;;  %5080 = vmatpush3.bf16.msra.mxu1 %v7471_v53 }
 0x114   : > { %4260 = vmatprep.mubr.f32.mxu0 %v7474_v24  ;;  %4596 = vmatprep.mubr.f32.mxu1 %v7475_v63 }
 0x115   : > { %4890 = vmatprep.subr.bf16.mxu0 %v7476_v30  ;;  %5082 = vmatprep.subr.bf16.mxu1 %v7476_v30 }
 0x116   : > { %4261 = vmatmul.mubr.f32.gmra.mrb[10].mxu0 %v7477_v2  ;;  %4597 = vmatmul.mubr.f32.gmra.mrb[10].mxu1 %v7478_v41  ;;  %v7543_v2 = vand.u32 4294901760, %v7482_v1  ;;  %v7544_v41 = vand.u32 4294901760, %v7483_v34 }
 0x117   : > { %4892 = vmatpush3.bf16.msra.mxu0 %v7476_v30  ;;  %5084 = vmatpush3.bf16.msra.mxu1 %v7476_v30  ;;  %v7486_v30 = vand.u32 4294901760, %v7485_v62  ;;  %v7491_v62 = vld [vmem:[#allocation14_spill] sm:$0xff] }
 0x118   : > { %4263 = vmatprep.mubr.f32.mxu0 %v7479_v31  ;;  %4599 = vmatprep.mubr.f32.mxu1 %v7480_v36  ;;  %v7492_v53 = vand.u32 4294901760, %v7491_v62  ;;  %v7501_v62 = vld [vmem:[#allocation17_spill] sm:$0xff] }
 0x119   : > { %4894 = vmatprep.subr.bf16.mxu0 %v7481_v44  ;;  %5086 = vmatprep.subr.bf16.mxu1 %v7481_v44  ;;  %v4901_v56 = vpack.c.bf16 %v7488_v32, %v7486_v30  ;;  %v7494_v32 = vand.u32 4294901760, %v7493_v51 }
 0x11a   : > { %4264 = vmatmul.mubr.f32.gmra.mrb[12].mxu0 %v7482_v1  ;;  %4600 = vmatmul.mubr.f32.gmra.mrb[12].mxu1 %v7483_v34  ;;  %v7549_v1 = vmov 1.0   ;;  %v7561_v34 = vld [vmem:[#allocation44_spill] sm:$0xff] }
 0x11b   : > { %4896 = vmatpush3.bf16.msra.mxu0 %v7481_v44  ;;  %5088 = vmatpush3.bf16.msra.mxu1 %v7481_v44  ;;  %v7489_v44 = vand.u32 4294901760, %v5965_v47  ;;  %v4905_v30 = vpack.c.bf16 %v7494_v32, %v7492_v53  ;;  %v7497_v47 = vand.u32 4294901760, %v6015_v59  ;;  %v7502_v53 = vand.u32 4294901760, %v7501_v62 }
 0x11c   : > { %4266 = vmatprep.mubr.f32.mxu0 %v6383_v39  ;;  %4602 = vmatprep.mubr.f32.mxu1 %v6381_v25  ;;  %v7505_v59 = vand.u32 4294901760, %v7459_v19  ;;  %v7513_v19 = vand.u32 4294901760, %v7464_v27  ;;  %v7521_v27 = vand.u32 4294901760, %v7469_v21  ;;  %v7529_v21 = vand.u32 4294901760, %v7474_v24 }
 0x11d   : > { %4898 = vmatprep.subr.bf16.mxu0 %v7484_v55  ;;  %5090 = vmatprep.subr.bf16.mxu1 %v7484_v55  ;;  %v7537_v24 = vand.u32 4294901760, %v7479_v31  ;;  %v7545_v31 = vand.u32 4294901760, %v6383_v39  ;;  %v7563_v39 = vld [vmem:[#allocation43_spill] sm:$0xff] }
 0x11e   : > { %4267 = vmatmul.mubr.f32.gmra.mrb[14].mxu0 %v6411_v6  ;;  %4603 = vmatmul.mubr.f32.gmra.mrb[14].mxu1 %v6409_v4 }
 0x11f   : > { %4900 = vmatpush3.bf16.msra.mxu0 %v7484_v55  ;;  %5092 = vmatpush3.bf16.msra.mxu1 %v7484_v55 }
 0x120   : > { %4301 = vmatprep.mubr.f32.mxu0 %v7489_v44  ;;  %4637 = vmatprep.mubr.f32.mxu1 %v7490_v60  ;;  %v7498_v60 = vand.u32 4294901760, %v7455_v23  ;;  %v7500_v44 = vand.u32 4294901760, %v7499_v29  ;;  %v7509_v23 = vld [vmem:[#allocation19_spill] sm:$0xff]  ;;  %v7517_v29 = vld [vmem:[#allocation21_spill] sm:$0xff] }
 0x121   : > { %4902 = vmatprep.subr.bf16.mxu0 %v4901_v56  ;;  %5094 = vmatprep.subr.bf16.mxu1 %v4901_v56  ;;  %v7510_v32 = vand.u32 4294901760, %v7509_v23 }
 0x122   : > { %4302 = vmatmul.mubr.f32.vlgmr.msra.gmra.mrb[0].mxu0 %v7495_v7  ;;  %4638 = vmatmul.mubr.f32.vlgmr.msra.gmra.mrb[0].mxu1 %v7496_v38  ;;  %v4909_v51 = vpack.c.bf16 %v7502_v53, %v7500_v44  ;;  %v7506_v7 = vand.u32 4294901760, %v7460_v43  ;;  %v7507_v38 = vld [vmem:[#allocation18_spill] sm:$0xff]  ;;  %v7514_v43 = vand.u32 4294901760, %v7465_v28  ;;  %v7518_v44 = vand.u32 4294901760, %v7517_v29  ;;  %v7572_v29 = vld [vmem:[#allocation51_spill] sm:$0xff] }
 0x123   : > { %4904 = vmatpush3.bf16.msra.mxu0 %v4901_v56  ;;  %5096 = vmatpush3.bf16.msra.mxu1 %v4901_v56  ;;  %v7508_v56 = vand.u32 4294901760, %v7507_v38  ;;  %v7522_v28 = vand.u32 4294901760, %v7470_v0  ;;  %v7523_v53 = vld [vmem:[#allocation22_spill] sm:$0xff]  ;;  %v7530_v0 = vand.u32 4294901760, %v7475_v63  ;;  %v7538_v63 = vand.u32 4294901760, %v7480_v36 }
 0x124   : > { %4304 = vmatprep.mubr.f32.mxu0 %v7497_v47  ;;  %4640 = vmatprep.mubr.f32.mxu1 %v7498_v60  ;;  %v7546_v36 = vand.u32 4294901760, %v6381_v25  ;;  %v7565_v25 = vld [vmem:[#allocation48_spill] sm:$0xff] }
 0x125   : > { %4906 = vmatprep.subr.bf16.mxu0 %v4905_v30  ;;  %5098 = vmatprep.subr.bf16.mxu1 %v4905_v30  ;;  %v4913_v47 = vpack.c.bf16 %v7510_v32, %v7508_v56  ;;  %v7533_v56 = vld [vmem:[#allocation25_spill] sm:$0xff] }
 0x126   : > { %4305 = vmatmul.mubr.f32.gmra.mrb[2].mxu0 %v7503_v57  ;;  %4641 = vmatmul.mubr.f32.gmra.mrb[2].mxu1 %v7504_v35  ;;  %v7525_v57 = vld [vmem:[#allocation23_spill] sm:$0xff]  ;;  %v7534_v23 = vand.u32 4294901760, %v7533_v56 }
 0x127   : > { %4908 = vmatpush3.bf16.msra.mxu0 %v4905_v30  ;;  %5100 = vmatpush3.bf16.msra.mxu1 %v4905_v30  ;;  %v7515_v30 = vld [vmem:[#allocation20_spill] sm:$0xff]  ;;  %v7526_v35 = vand.u32 4294901760, %v7525_v57 }
 0x128   : > { %4307 = vmatprep.mubr.f32.mxu0 %v7505_v59  ;;  %4643 = vmatprep.mubr.f32.mxu1 %v7506_v7  ;;  %v7516_v60 = vand.u32 4294901760, %v7515_v30  ;;  %v7531_v7 = vld [vmem:[#allocation24_spill] sm:$0xff]  ;;  %v7547_v30 = vand.u32 4294901760, %v6411_v6 }
 0x129   : > { %4910 = vmatprep.subr.bf16.mxu0 %v4909_v51  ;;  %5102 = vmatprep.subr.bf16.mxu1 %v4909_v51  ;;  %v7532_v38 = vand.u32 4294901760, %v7531_v7  ;;  %v7560_v6 = vld [vmem:[#allocation8_spill] sm:$0xff] }
 0x12a   : > { %4308 = vmatmul.mubr.f32.gmra.mrb[4].mxu0 %v7511_v22  ;;  %4644 = vmatmul.mubr.f32.gmra.mrb[4].mxu1 %v7512_v18  ;;  %v4917_v62 = vpack.c.bf16 %v7518_v44, %v7516_v60  ;;  %v7541_v18 = vld [vmem:[#allocation27_spill] sm:$0xff]  ;;  %v7548_v60 = vand.u32 4294901760, %v6409_v4  ;;  %v7574_v44 = vld [vmem:[#allocation56_spill] sm:$0xff] }
 0x12b   : > { %4912 = vmatpush3.bf16.msra.mxu0 %v4909_v51  ;;  %5104 = vmatpush3.bf16.msra.mxu1 %v4909_v51  ;;  %v7524_v51 = vand.u32 4294901760, %v7523_v53  ;;  %v4925_v32 = vpack.c.bf16 %v7534_v23, %v7532_v38  ;;  %v7558_v4 = vld [vmem:[#allocation39_spill] sm:$0xff] }
 0x12c   : > { %4310 = vmatprep.mubr.f32.mxu0 %v7513_v19  ;;  %4646 = vmatprep.mubr.f32.mxu1 %v7514_v43  ;;  %v7542_v19 = vand.u32 4294901760, %v7541_v18  ;;  %v7585_v53 = vld [vmem:[#allocation63_spill] sm:$0xff] }
 0x12d   : > { %4914 = vmatprep.subr.bf16.mxu0 %v4913_v47  ;;  %5106 = vmatprep.subr.bf16.mxu1 %v4913_v47  ;;  %v4921_v59 = vpack.c.bf16 %v7526_v35, %v7524_v51 }
 0x12e   : > { %4311 = vmatmul.mubr.f32.gmra.mrb[6].mxu0 %v7519_v46  ;;  %4647 = vmatmul.mubr.f32.gmra.mrb[6].mxu1 %v7520_v26  ;;  %v7578_v46 = vld [vmem:[#allocation10_spill] sm:$0xff]  ;;  %v7579_v26 = vld [vmem:[#allocation60_spill] sm:$0xff] }
 0x12f   : > { %4916 = vmatpush3.bf16.msra.mxu0 %v4913_v47  ;;  %5108 = vmatpush3.bf16.msra.mxu1 %v4913_v47  ;;  %v7539_v47 = vld [vmem:[#allocation26_spill] sm:$0xff] }
 0x130   : > { %4313 = vmatprep.mubr.f32.mxu0 %v7521_v27  ;;  %4649 = vmatprep.mubr.f32.mxu1 %v7522_v28  ;;  %v7540_v22 = vand.u32 4294901760, %v7539_v47  ;;  %v7581_v27 = vld [vmem:[#allocation59_spill] sm:$0xff]  ;;  %v7583_v28 = vld [vmem:[#allocation64_spill] sm:$0xff] }
 0x131   : > { %4918 = vmatprep.subr.bf16.mxu0 %v4917_v62  ;;  %5110 = vmatprep.subr.bf16.mxu1 %v4917_v62 }
 0x132   : > { %4314 = vmatmul.mubr.f32.gmra.mrb[8].mxu0 %v7527_v14  ;;  %4650 = vmatmul.mubr.f32.gmra.mrb[8].mxu1 %v7528_v49  ;;  %v4929_v43 = vpack.c.bf16 %v7542_v19, %v7540_v22 }
 0x133   : > { %4920 = vmatpush3.bf16.msra.mxu0 %v4917_v62  ;;  %5112 = vmatpush3.bf16.msra.mxu1 %v4917_v62  ;;  %v7576_v62 = vld [vmem:[#allocation55_spill] sm:$0xff] }
 0x134   : > { %4316 = vmatprep.mubr.f32.mxu0 %v7529_v21  ;;  %4652 = vmatprep.mubr.f32.mxu1 %v7530_v0 }
 0x135   : > { %4922 = vmatprep.subr.bf16.mxu0 %v4921_v59  ;;  %5114 = vmatprep.subr.bf16.mxu1 %v4921_v59 }
 0x136   : > { %4317 = vmatmul.mubr.f32.gmra.mrb[10].mxu0 %v7535_v61  ;;  %4653 = vmatmul.mubr.f32.gmra.mrb[10].mxu1 %v7536_v37 }
 0x137   : > { %4924 = vmatpush3.bf16.msra.mxu0 %v4921_v59  ;;  %5116 = vmatpush3.bf16.msra.mxu1 %v4921_v59 }
 0x138   : > { %4319 = vmatprep.mubr.f32.mxu0 %v7537_v24  ;;  %4655 = vmatprep.mubr.f32.mxu1 %v7538_v63 }
 0x139   : > { %4926 = vmatprep.subr.bf16.mxu0 %v4925_v32  ;;  %5118 = vmatprep.subr.bf16.mxu1 %v4925_v32 }
 0x13a   : > { %4320 = vmatmul.mubr.f32.gmra.mrb[12].mxu0 %v7543_v2  ;;  %4656 = vmatmul.mubr.f32.gmra.mrb[12].mxu1 %v7544_v41 }
 0x13b   : > { %4928 = vmatpush3.bf16.msra.mxu0 %v4925_v32  ;;  %5120 = vmatpush3.bf16.msra.mxu1 %v4925_v32 }
 0x13c   : > { %4322 = vmatprep.mubr.f32.mxu0 %v7545_v31  ;;  %4658 = vmatprep.mubr.f32.mxu1 %v7546_v36 }
 0x13d   : > { %4930 = vmatprep.subr.bf16.mxu0 %v4929_v43  ;;  %5122 = vmatprep.subr.bf16.mxu1 %v4929_v43 }
 0x13e   : > { %4323 = vmatmul.mubr.f32.gmra.mrb[14].mxu0 %v7547_v30  ;;  %4659 = vmatmul.mubr.f32.gmra.mrb[14].mxu1 %v7548_v60 }
 0x13f   : > { %4932 = vmatpush3.bf16.msra.mxu0 %v4929_v43  ;;  %5124 = vmatpush3.bf16.msra.mxu1 %v4929_v43 }
 0x140   : > { %4357 = vmatprep.mubr.msk.f32.mxu0 %vm356_vm2, %v7549_v1  ;;  %4693 = vmatprep.mubr.msk.f32.mxu1 %vm468_vm4, %v7549_v1 }
 0x141   : > { %4934 = vmatprep.subr.bf16.mxu0 %v5589_v20  ;;  %5126 = vmatprep.subr.bf16.mxu1 %v5589_v20 }
 0x142   : > { %4358 = vmatmul.mubr.msk.f32.vlgmr.msra.gmra.mrb[0].mxu0 %vm357_vm1, %v7549_v1  ;;  %4694 = vmatmul.mubr.msk.f32.vlgmr.msra.gmra.mrb[0].mxu1 %vm469_vm3, %v7549_v1 }
 0x143   : > { %4936 = vmatpush3.bf16.msra.mxu0 %v5589_v20  ;;  %5128 = vmatpush3.bf16.msra.mxu1 %v5589_v20  ;;  %v7556_v20 = vld [vmem:[#allocation40_spill] sm:$0xff] }
 0x144   : > { %4360 = vmatprep.mubr.msk.f32.mxu0 %vm358_vm6, %v7549_v1  ;;  %4696 = vmatprep.mubr.msk.f32.mxu1 %vm470_vm5, %v7549_v1 }
 0x145   : > { %4938 = vmatprep.subr.bf16.mxu0 %v7456_v10  ;;  %5130 = vmatprep.subr.bf16.mxu1 %v7456_v10 }
 0x146   : > { %4361 = vmatmul.mubr.msk.f32.gmra.mrb[2].mxu0 %vm359_vm8, %v7549_v1  ;;  %4697 = vmatmul.mubr.msk.f32.gmra.mrb[2].mxu1 %vm471_vm7, %v7549_v1 }
 0x147   : > { %4940 = vmatpush3.bf16.msra.mxu0 %v7456_v10  ;;  %5132 = vmatpush3.bf16.msra.mxu1 %v7456_v10  ;;  %v7567_v10 = vld [vmem:[#allocation47_spill] sm:$0xff] }
 0x148   : > { %4363 = vmatprep.mubr.msk.f32.mxu0 %vm360_vm10, %v7549_v1  ;;  %4699 = vmatprep.mubr.msk.f32.mxu1 %vm472_vm9, %v7549_v1 }
 0x149   : > { %4942 = vmatprep.subr.bf16.mxu0 %v7461_v40  ;;  %5134 = vmatprep.subr.bf16.mxu1 %v7461_v40 }
 0x14a   : > { %4364 = vmatmul.mubr.msk.f32.gmra.mrb[4].mxu0 %vm7550_vm11, %v7549_v1  ;;  %4700 = vmatmul.mubr.msk.f32.gmra.mrb[4].mxu1 %vm7551_vm12, %v7549_v1  ;;  %vm7554_vm11 = vcmp.eq.s32.totalorder %v5945_v48, %v6144_v16  ;;  %vm7555_vm12 = vcmp.eq.s32.totalorder %v5945_v48, %v6142_v45 }
 0x14b   : > { %4944 = vmatpush3.bf16.msra.mxu0 %v7461_v40  ;;  %5136 = vmatpush3.bf16.msra.mxu1 %v7461_v40  ;;  %v7569_v40 = vld [vmem:[#allocation9_spill] sm:$0xff] }
 0x14c   : > { %4366 = vmatprep.mubr.msk.f32.mxu0 %vm7552_vm13, %v7549_v1  ;;  %4702 = vmatprep.mubr.msk.f32.mxu1 %vm7553_vm14, %v7549_v1  ;;  %vm7557_vm13 = vcmp.eq.s32.totalorder %v5945_v48, %v7556_v20  ;;  %vm7559_vm14 = vcmp.eq.s32.totalorder %v5945_v48, %v7558_v4 }
 0x14d   : > { %4946 = vmatprep.subr.bf16.mxu0 %v7466_v11  ;;  %5138 = vmatprep.subr.bf16.mxu1 %v7466_v11 }
 0x14e   : > { %4367 = vmatmul.mubr.msk.f32.gmra.mrb[6].mxu0 %vm7554_vm11, %v7549_v1  ;;  %4703 = vmatmul.mubr.msk.f32.gmra.mrb[6].mxu1 %vm7555_vm12, %v7549_v1  ;;  %vm7562_vm11 = vcmp.eq.s32.totalorder %v5945_v48, %v7561_v34  ;;  %vm7564_vm12 = vcmp.eq.s32.totalorder %v5945_v48, %v7563_v39 }
 0x14f   : > { %4948 = vmatpush3.bf16.msra.mxu0 %v7466_v11  ;;  %5140 = vmatpush3.bf16.msra.mxu1 %v7466_v11  ;;  %v7570_v11 = vld [vmem:[#allocation52_spill] sm:$0xff] }
 0x150   : > { %4369 = vmatprep.mubr.msk.f32.mxu0 %vm7557_vm13, %v7549_v1  ;;  %4705 = vmatprep.mubr.msk.f32.mxu1 %vm7559_vm14, %v7549_v1  ;;  %vm7566_vm13 = vcmp.eq.s32.totalorder %v5945_v48, %v7565_v25  ;;  %vm7568_vm14 = vcmp.eq.s32.totalorder %v5945_v48, %v7567_v10 }
 0x151   : > { %4950 = vmatprep.subr.bf16.mxu0 %v7560_v6  ;;  %5142 = vmatprep.subr.bf16.mxu1 %v7560_v6 }
 0x152   : > { %4370 = vmatmul.mubr.msk.f32.gmra.mrb[8].mxu0 %vm7562_vm11, %v7549_v1  ;;  %4706 = vmatmul.mubr.msk.f32.gmra.mrb[8].mxu1 %vm7564_vm12, %v7549_v1  ;;  %vm7571_vm11 = vcmp.eq.s32.totalorder %v5945_v48, %v7570_v11  ;;  %vm7573_vm12 = vcmp.eq.s32.totalorder %v5945_v48, %v7572_v29 }
 0x153   : > { %4952 = vmatpush3.bf16.msra.mxu0 %v7560_v6  ;;  %5144 = vmatpush3.bf16.msra.mxu1 %v7560_v6 }
 0x154   : > { %4372 = vmatprep.mubr.msk.f32.mxu0 %vm7566_vm13, %v7549_v1  ;;  %4708 = vmatprep.mubr.msk.f32.mxu1 %vm7568_vm14, %v7549_v1  ;;  %vm7575_vm13 = vcmp.eq.s32.totalorder %v5945_v48, %v7574_v44  ;;  %vm7577_vm14 = vcmp.eq.s32.totalorder %v5945_v48, %v7576_v62 }
 0x155   : > { %4954 = vmatprep.subr.bf16.mxu0 %v7569_v40  ;;  %5146 = vmatprep.subr.bf16.mxu1 %v7569_v40 }
 0x156   : > { %4373 = vmatmul.mubr.msk.f32.gmra.mrb[10].mxu0 %vm7571_vm11, %v7549_v1  ;;  %4709 = vmatmul.mubr.msk.f32.gmra.mrb[10].mxu1 %vm7573_vm12, %v7549_v1  ;;  %vm7580_vm11 = vcmp.eq.s32.totalorder %v5945_v48, %v7579_v26  ;;  %vm7582_vm12 = vcmp.eq.s32.totalorder %v5945_v48, %v7581_v27 }
 0x157   : > { %4956 = vmatpush3.bf16.msra.mxu0 %v7569_v40  ;;  %5148 = vmatpush3.bf16.msra.mxu1 %v7569_v40 }
 0x158   : > { %4375 = vmatprep.mubr.msk.f32.mxu0 %vm7575_vm13, %v7549_v1  ;;  %4711 = vmatprep.mubr.msk.f32.mxu1 %vm7577_vm14, %v7549_v1  ;;  %vm7584_vm13 = vcmp.eq.s32.totalorder %v5945_v48, %v7583_v28  ;;  %vm7586_vm14 = vcmp.eq.s32.totalorder %v5945_v48, %v7585_v53 }
 0x159   : > { %4958 = vmatprep.subr.bf16.mxu0 %v7578_v46  ;;  %5150 = vmatprep.subr.bf16.mxu1 %v7578_v46 }
 0x15a   : > { %4376 = vmatmul.mubr.msk.f32.gmra.mrb[12].mxu0 %vm7580_vm11, %v7549_v1  ;;  %4712 = vmatmul.mubr.msk.f32.gmra.mrb[12].mxu1 %vm7582_vm12, %v7549_v1  ;;  %vm7599_vm11 = vcmp.eq.s32.totalorder %v5945_v48, %v7565_v25  ;;  %vm7600_vm12 = vcmp.eq.s32.totalorder %v5945_v48, %v7567_v10 }
 0x15b   : > { %4960 = vmatpush3.bf16.msra.mxu0 %v7578_v46  ;;  %5152 = vmatpush3.bf16.msra.mxu1 %v7578_v46 }
 0x15c   : > { %4378 = vmatprep.mubr.msk.f32.mxu0 %vm7584_vm13, %v7549_v1  ;;  %4714 = vmatprep.mubr.msk.f32.mxu1 %vm7586_vm14, %v7549_v1  ;;  %vm7601_vm13 = vcmp.eq.s32.totalorder %v5945_v48, %v7570_v11  ;;  %vm7602_vm14 = vcmp.eq.s32.totalorder %v5945_v48, %v7572_v29 }
 0x15d   : > { %4962 = vmatprep.subr.bf16.mxu0 %v7484_v55  ;;  %5154 = vmatprep.subr.bf16.mxu1 %v7484_v55 }
 0x15e   : > { %4379 = vmatmul.mubr.msk.f32.gmra.mrb[14].mxu0 %vm371_vm0, %v7549_v1  ;;  %4715 = vmatmul.mubr.msk.f32.gmra.mrb[14].mxu1 %vm483_vm15, %v7549_v1 }
 0x15f   : > { %4964 = vmatpush3.bf16.msra.mxu0 %v7484_v55  ;;  %5156 = vmatpush3.bf16.msra.mxu1 %v7484_v55 }
 0x160   : > { %4413 = vmatprep.mubr.msk.f32.mxu0 %vm356_vm2, %v7549_v1  ;;  %4749 = vmatprep.mubr.msk.f32.mxu1 %vm468_vm4, %v7549_v1  ;;  %vm7590_vm2 = vcmp.eq.s32.totalorder %v5945_v48, %v6078_v52  ;;  %vm7592_vm4 = vcmp.eq.s32.totalorder %v5945_v48, %v6117_v3 }
 0x162   : > { %4414 = vmatmul.mubr.msk.f32.vlgmr.msra.gmra.mrb[0].mxu0 %vm357_vm1, %v7549_v1  ;;  %4750 = vmatmul.mubr.msk.f32.vlgmr.msra.gmra.mrb[0].mxu1 %vm469_vm3, %v7549_v1  ;;  %vm7589_vm1 = vcmp.eq.s32.totalorder %v5945_v48, %v6080_v15  ;;  %vm7591_vm3 = vcmp.eq.s32.totalorder %v5945_v48, %v6119_v42 }
 0x163   : > { %4416 = vmatprep.mubr.msk.f32.mxu0 %vm358_vm6, %v7549_v1  ;;  %4752 = vmatprep.mubr.msk.f32.mxu1 %vm470_vm5, %v7549_v1  ;;  %vm7593_vm5 = vcmp.eq.s32.totalorder %v5945_v48, %v6144_v16  ;;  %vm7594_vm6 = vcmp.eq.s32.totalorder %v5945_v48, %v6142_v45 }
 0x166   : > { %4417 = vmatmul.mubr.msk.f32.gmra.mrb[2].mxu0 %vm359_vm8, %v7549_v1  ;;  %4753 = vmatmul.mubr.msk.f32.gmra.mrb[2].mxu1 %vm471_vm7, %v7549_v1  ;;  %vm7595_vm7 = vcmp.eq.s32.totalorder %v5945_v48, %v7556_v20  ;;  %vm7596_vm8 = vcmp.eq.s32.totalorder %v5945_v48, %v7558_v4 }
 0x167   : > { %4419 = vmatprep.mubr.msk.f32.mxu0 %vm360_vm10, %v7549_v1  ;;  %4755 = vmatprep.mubr.msk.f32.mxu1 %vm472_vm9, %v7549_v1  ;;  %vm7597_vm9 = vcmp.eq.s32.totalorder %v5945_v48, %v7561_v34  ;;  %vm7598_vm10 = vcmp.eq.s32.totalorder %v5945_v48, %v7563_v39 }
 0x16a   : > { %4420 = vmatmul.mubr.msk.f32.gmra.mrb[4].mxu0 %vm7589_vm1, %v7549_v1  ;;  %4756 = vmatmul.mubr.msk.f32.gmra.mrb[4].mxu1 %vm7590_vm2, %v7549_v1  ;;  %vm7603_vm1 = vcmp.eq.s32.totalorder %v5945_v48, %v7574_v44  ;;  %vm7604_vm2 = vcmp.eq.s32.totalorder %v5945_v48, %v7576_v62 }
 0x16b   : > { %4422 = vmatprep.mubr.msk.f32.mxu0 %vm7591_vm3, %v7549_v1  ;;  %4758 = vmatprep.mubr.msk.f32.mxu1 %vm7592_vm4, %v7549_v1  ;;  %vm7605_vm3 = vcmp.eq.s32.totalorder %v5945_v48, %v7579_v26  ;;  %vm7606_vm4 = vcmp.eq.s32.totalorder %v5945_v48, %v7581_v27 }
 0x16e   : > { %4423 = vmatmul.mubr.msk.f32.gmra.mrb[6].mxu0 %vm7593_vm5, %v7549_v1  ;;  %4759 = vmatmul.mubr.msk.f32.gmra.mrb[6].mxu1 %vm7594_vm6, %v7549_v1  ;;  %vm7607_vm5 = vcmp.eq.s32.totalorder %v5945_v48, %v7583_v28  ;;  %vm7608_vm6 = vcmp.eq.s32.totalorder %v5945_v48, %v7585_v53 }
 0x16f   : > { %4425 = vmatprep.mubr.msk.f32.mxu0 %vm7595_vm7, %v7549_v1  ;;  %4761 = vmatprep.mubr.msk.f32.mxu1 %vm7596_vm8, %v7549_v1 }
 0x172   : > { %4426 = vmatmul.mubr.msk.f32.gmra.mrb[8].mxu0 %vm7597_vm9, %v7549_v1  ;;  %4762 = vmatmul.mubr.msk.f32.gmra.mrb[8].mxu1 %vm7598_vm10, %v7549_v1 }
 0x173   : > { %4428 = vmatprep.mubr.msk.f32.mxu0 %vm7599_vm11, %v7549_v1  ;;  %4764 = vmatprep.mubr.msk.f32.mxu1 %vm7600_vm12, %v7549_v1  ;;  %vm3409_vm12 = vcmask 7168  }
 0x176   : > { %4429 = vmatmul.mubr.msk.f32.gmra.mrb[10].mxu0 %vm7601_vm13, %v7549_v1  ;;  %4765 = vmatmul.mubr.msk.f32.gmra.mrb[10].mxu1 %vm7602_vm14, %v7549_v1 }
 0x177   : > { %4431 = vmatprep.mubr.msk.f32.mxu0 %vm7603_vm1, %v7549_v1  ;;  %4767 = vmatprep.mubr.msk.f32.mxu1 %vm7604_vm2, %v7549_v1 }
 0x17a   : > { %4432 = vmatmul.mubr.msk.f32.gmra.mrb[12].mxu0 %vm7605_vm3, %v7549_v1  ;;  %4768 = vmatmul.mubr.msk.f32.gmra.mrb[12].mxu1 %vm7606_vm4, %v7549_v1 }
 0x17b   : > { %4434 = vmatprep.mubr.msk.f32.mxu0 %vm7607_vm5, %v7549_v1  ;;  %4770 = vmatprep.mubr.msk.f32.mxu1 %vm7608_vm6, %v7549_v1 }
 0x17e   : > { %4435 = vmatmul.mubr.msk.f32.gmra.mrb[14].mxu0 %vm371_vm0, %v7549_v1  ;;  %4771 = vmatmul.mubr.msk.f32.gmra.mrb[14].mxu1 %vm483_vm15, %v7549_v1 }
 0x235   : > { %v4415_v16 = vpop.f32.mrb[0].mxu0  ;;  %v4751_v50 = vpop.f32.mrb[0].mxu1 }
 0x236   : > { %v3105_v58 = vmul.f32 %v4751_v50, %v4415_v16  ;;  %v1724_v15 = vpop.f32.mrb[1].mxu0  ;;  %v3010_v17 = vpop.f32.mrb[1].mxu1 }
 0x237   : > { %v3104_v13 = vmul.f32 %v3010_v17, %v1724_v15 }
 0x238   : > { %3122 = vadd.xlane.f32.xlu1 %v3105_v58 }
 0x239   : > { %v4754_v33 = vpop.f32.mrb[2].mxu1  ;;  %3120 = vadd.xlane.f32.xlu0 %v3104_v13  ;;  %v4418_v5 = vpop.f32.mrb[2].mxu0 }
 0x23a   : > { %v3107_v8 = vmul.f32 %v4754_v33, %v4418_v5  ;;  %v1736_v54 = vpop.f32.mrb[3].mxu0  ;;  %v3022_v9 = vpop.f32.mrb[3].mxu1 }
 0x23b   : > { %v3106_v12 = vmul.f32 %v3022_v9, %v1736_v54 }
 0x23d   : > { %v4757_v52 = vpop.f32.mrb[4].mxu1  ;;  %3124 = vadd.xlane.f32.xlu0 %v3106_v12  ;;  %v4421_v3 = vpop.f32.mrb[4].mxu0 }
 0x23e   : > { %v3109_v42 = vmul.f32 %v4757_v52, %v4421_v3  ;;  %v1748_v48 = vpop.f32.mrb[5].mxu0  ;;  %v3034_v45 = vpop.f32.mrb[5].mxu1  ;;  %v3249_v3 = vld [vmem:[%s5540_s9 + $0x8] sm:$0xff] }
 0x23f   : > { %v3108_v55 = vmul.f32 %v3034_v45, %v1748_v48  ;;  %v3248_v45 = vld [vmem:[%s5540_s9] sm:$0xff]  ;;  %vm3265_vm15 = vcmp.lt.f32.partialorder %v3249_v3, 0.0 }
 0x240   : > { %vm3264_vm0 = vcmp.lt.f32.partialorder %v3248_v45, 0.0 }
 0x241   : > { %v4760_v35 = vpop.f32.mrb[6].mxu1  ;;  %3126 = vadd.xlane.f32.xlu0 %v3107_v8  ;;  %3128 = vadd.xlane.f32.xlu1 %v3108_v55  ;;  %v4424_v59 = vpop.f32.mrb[6].mxu0 }
 0x242   : > { %v3111_v14 = vmul.f32 %v4760_v35, %v4424_v59  ;;  %v1760_v49 = vpop.f32.mrb[7].mxu0  ;;  %v3046_v21 = vpop.f32.mrb[7].mxu1 }
 0x243   : > { %v3110_v0 = vmul.f32 %v3046_v21, %v1760_v49 }
 0x245   : > { %v4763_v7 = vpop.f32.mrb[8].mxu1  ;;  %3130 = vadd.xlane.f32.xlu0 %v3109_v42  ;;  %3132 = vadd.xlane.f32.xlu1 %v3110_v0  ;;  %v4427_v38 = vpop.f32.mrb[8].mxu0 }
 0x246   : > { %v3113_v56 = vmul.f32 %v4763_v7, %v4427_v38  ;;  %v1772_v23 = vpop.f32.mrb[9].mxu0  ;;  %v3058_v32 = vpop.f32.mrb[9].mxu1 }
 0x247   : > { %v3112_v61 = vmul.f32 %v3058_v32, %v1772_v23  ;;  %v3250_v23 = vld [vmem:[%s5540_s9 + $0x10] sm:$0xff] }
 0x248   : > { %vm3266_vm7 = vcmp.lt.f32.partialorder %v3250_v23, 0.0 }
 0x249   : > { %v4766_v37 = vpop.f32.mrb[10].mxu1  ;;  %3134 = vadd.xlane.f32.xlu0 %v3111_v14  ;;  %3136 = vadd.xlane.f32.xlu1 %v3112_v61  ;;  %v4430_v24 = vpop.f32.mrb[10].mxu0  ;;  %v3313_v61 = vand.u32 2147483647, %v3249_v3 }
 0x24a   : > { %v3115_v63 = vmul.f32 %v4766_v37, %v4430_v24  ;;  %v1784_v47 = vpop.f32.mrb[11].mxu0  ;;  %v3070_v22 = vpop.f32.mrb[11].mxu1 }
 0x24b   : > { %v3114_v18 = vmul.f32 %v3070_v22, %v1784_v47 }
 0x24d   : > { %v4769_v19 = vpop.f32.mrb[12].mxu1  ;;  %3138 = vadd.xlane.f32.xlu0 %v3113_v56  ;;  %3140 = vadd.xlane.f32.xlu1 %v3114_v18  ;;  %v4433_v43 = vpop.f32.mrb[12].mxu0  ;;  %v7037_v18 = vld [vmem:[%s5540_s9 + $0x18] sm:$0xff] }
 0x24e   : > { %v3117_v2 = vmul.f32 %v4769_v19, %v4433_v43  ;;  %v1796_v41 = vpop.f32.mrb[13].mxu0  ;;  %v3082_v31 = vpop.f32.mrb[13].mxu1  ;;  %vm3267_vm8 = vcmp.lt.f32.partialorder %v7037_v18, 0.0 }
 0x24f   : > { %v3116_v36 = vmul.f32 %v3082_v31, %v1796_v41  ;;  %v3252_v41 = vld [vmem:[%s5540_s9 + $0x20] sm:$0xff]  ;;  %v7041_v31 = vld [vmem:[%s5540_s9 + $0x28] sm:$0xff] }
 0x250   : > { %vm3268_vm9 = vcmp.lt.f32.partialorder %v3252_v41, 0.0  ;;  %vm3269_vm10 = vcmp.lt.f32.partialorder %v7041_v31, 0.0  ;;  %v3317_v3 = vand.u32 2147483647, %v7041_v31 }
 0x251   : > { %v4772_v30 = vpop.f32.mrb[14].mxu1  ;;  %3142 = vadd.xlane.f32.xlu0 %v3115_v63  ;;  %3144 = vadd.xlane.f32.xlu1 %v3116_v36  ;;  %v4436_v60 = vpop.f32.mrb[14].mxu0 }
 0x252   : > { %v3119_v1 = vmul.f32 %v4772_v30, %v4436_v60  ;;  %v1808_v20 = vpop.f32.mrb[15].mxu0  ;;  %v3094_v4 = vpop.f32.mrb[15].mxu1  ;;  %v3312_v60 = vand.u32 2147483647, %v3248_v45 }
 0x253   : > { %v3118_v6 = vmul.f32 %v3094_v4, %v1808_v20 }
 0x255   : > { %3146 = vadd.xlane.f32.xlu0 %v3117_v2  ;;  %3148 = vadd.xlane.f32.xlu1 %v3118_v6  ;;  %v7043_v6 = vsub.f32 0.0, %v3313_v61  ;;  %v7083_v61 = vsub.f32 0.0, %v3317_v3 }
 0x259   : > { %3150 = vadd.xlane.f32.xlu0 %v3119_v1  ;;  %v3314_v1 = vand.u32 2147483647, %v3250_v23 }
 0x2c5   : > { %v3123_v34 = vpop.xlane.xlu1 %3122 }
 0x2c6   : > { %v3697_v39 = vmul.f32 -1.442695, %v3123_v34  ;;  %v3121_v25 = vpop.xlane.xlu0 %3120  ;;  %v7047_v34 = vld [vmem:[%s5540_s9 + $0x30] sm:$0xff] }
 0x2c7   : > { %v3696_v10 = vmul.f32 -1.442695, %v3121_v25  ;;  %vm3270_vm11 = vcmp.lt.f32.partialorder %v7047_v34, 0.0 }
 0x2c8   : > { %5338 = vpow2.f32 %v3697_v39 }
 0x2c9   : > { %5340 = vpow2.f32 %v3696_v10 }
 0x2ca   : > { %v3125_v40 = vpop.xlane.xlu0 %3124 }
 0x2cb   : > { %v3698_v11 = vmul.f32 -1.442695, %v3125_v40  ;;  %v7052_v40 = vld [vmem:[%s5540_s9 + $0x38] sm:$0xff] }
 0x2cc   : > { %vm3271_vm13 = vcmp.lt.f32.partialorder %v7052_v40, 0.0 }
 0x2cd   : > { %5342 = vpow2.f32 %v3698_v11 }
 0x2ce   : > { %v3127_v29 = vpop.xlane.xlu0 %3126  ;;  %v3129_v44 = vpop.xlane.xlu1 %3128 }
 0x2cf   : > { %v3699_v62 = vmul.f32 -1.442695, %v3127_v29  ;;  %v3700_v46 = vmul.f32 -1.442695, %v3129_v44  ;;  %v7055_v44 = vld [vmem:[%s5540_s9 + $0x40] sm:$0xff] }
 0x2d0   : > { %vm3272_vm14 = vcmp.lt.f32.partialorder %v7055_v44, 0.0 }
 0x2d1   : > { %5344 = vpow2.f32 %v3699_v62 }
 0x2d2   : > { %v5339_v26 = vpop.eup %5338  ;;  %5346 = vpow2.f32 %v3700_v46  ;;  %v3131_v27 = vpop.xlane.xlu0 %3130 }
 0x2d3   : > { %v3133_v28 = vpop.xlane.xlu1 %3132  ;;  %v5341_v53 = vpop.eup %5340  ;;  %v3201_v51 = vadd.f32 1.0, %v5339_v26  ;;  %v3701_v57 = vmul.f32 -1.442695, %v3131_v27  ;;  %v3328_v27 = vsub.f32 0.0, %v3312_v60 }
 0x2d4   : > { %v3200_v16 = vadd.f32 1.0, %v5341_v53  ;;  %v3702_v50 = vmul.f32 -1.442695, %v3133_v28  ;;  %v7057_v28 = vsub.f32 0.0, %v3314_v1 }
 0x2d5   : > { %5348 = vrcp.f32 %v3201_v51 }
 0x2d6   : > { %5350 = vrcp.f32 %v3200_v16  ;;  %v3135_v58 = vpop.xlane.xlu0 %3134  ;;  %v3316_v16 = vand.u32 2147483647, %v3252_v41 }
 0x2d7   : > { %v3137_v15 = vpop.xlane.xlu1 %3136  ;;  %v5343_v17 = vpop.eup %5342  ;;  %5352 = vpow2.f32 %v3701_v57  ;;  %v3703_v13 = vmul.f32 -1.442695, %v3135_v58  ;;  %v3315_v57 = vand.u32 2147483647, %v7037_v18 }
 0x2d8   : > { %v3704_v33 = vmul.f32 -1.442695, %v3137_v15  ;;  %v3202_v5 = vadd.f32 1.0, %v5343_v17  ;;  %5354 = vpow2.f32 %v3702_v50 }
 0x2d9   : > { %5356 = vpow2.f32 %v3703_v13 }
 0x2da   : > { %5358 = vrcp.f32 %v3202_v5  ;;  %v3139_v8 = vpop.xlane.xlu0 %3138 }
 0x2db   : > { %v3141_v54 = vpop.xlane.xlu1 %3140  ;;  %v5345_v9 = vpop.eup %5344  ;;  %5360 = vpow2.f32 %v3704_v33  ;;  %v3705_v12 = vmul.f32 -1.442695, %v3139_v8 }
 0x2dc   : > { %v5347_v52 = vpop.eup %5346  ;;  %v3203_v42 = vadd.f32 1.0, %v5345_v9  ;;  %v3706_v48 = vmul.f32 -1.442695, %v3141_v54  ;;  %v7067_v54 = vld [vmem:[%s5540_s9 + $0x48] sm:$0xff] }
 0x2dd   : > { %v3204_v55 = vadd.f32 1.0, %v5347_v52  ;;  %5362 = vpow2.f32 %v3705_v12  ;;  %vm3273_vm1 = vcmp.lt.f32.partialorder %v7067_v54, 0.0 }
 0x2de   : > { %5364 = vrcp.f32 %v3203_v42  ;;  %v3143_v35 = vpop.xlane.xlu0 %3142  ;;  %v7071_v42 = vld [vmem:[%s5540_s9 + $0x50] sm:$0xff] }
 0x2df   : > { %v3145_v59 = vpop.xlane.xlu1 %3144  ;;  %v5349_v14 = vpop.eup %5348  ;;  %5366 = vrcp.f32 %v3204_v55  ;;  %v3707_v49 = vmul.f32 -1.442695, %v3143_v35  ;;  %v7073_v55 = vsub.f32 0.0, %v3315_v57  ;;  %v7075_v35 = vsub.f32 0.0, %v3316_v16 }
 0x2e0   : > { %v3708_v21 = vmul.f32 -1.442695, %v3145_v59  ;;  %v5351_v0 = vpop.eup %5350  ;;  %v3281_v7 = vsub.f32 1.0, %v5349_v14  ;;  %5368 = vpow2.f32 %v3706_v48  ;;  %vm3274_vm2 = vcmp.lt.f32.partialorder %v7071_v42, 0.0 }
 0x2e1   : > { %v5353_v38 = vpop.eup %5352  ;;  %v3280_v56 = vsub.f32 1.0, %v5351_v0  ;;  %5370 = vpow2.f32 %v3707_v49 }
 0x2e2   : > { %v5355_v32 = vpop.eup %5354  ;;  %v3297_v37 = vsel %vm3265_vm15, %v3281_v7, %v5349_v14  ;;  %v3205_v24 = vadd.f32 1.0, %v5353_v38  ;;  %5372 = vpow2.f32 %v3708_v21  ;;  %v3147_v4 = vpop.xlane.xlu0 %3146  ;;  %v3318_v38 = vand.u32 2147483647, %v7047_v34 }
 0x2e3   : > { %v5357_v63 = vpop.eup %5356  ;;  %v3345_v47 = vadd.f32 1e-15, %v3297_v37  ;;  %v3296_v22 = vsel %vm3264_vm0, %v3280_v56, %v5351_v0  ;;  %v3206_v19 = vadd.f32 1.0, %v5355_v32  ;;  %v3709_v46 = vmul.f32 -1.442695, %v3147_v4  ;;  %v3149_v13 = vpop.xlane.xlu1 %3148  ;;  %v7081_v56 = vld [vmem:[%s5540_s9 + $0x58] sm:$0xff] }
 0x2e4   : > { %v5359_v43 = vpop.eup %5358  ;;  %v3344_v2 = vadd.f32 1e-15, %v3296_v22  ;;  %5374 = vrcp.f32 %v3205_v24  ;;  %v3207_v36 = vadd.f32 1.0, %v5357_v63  ;;  %v3710_v59 = vmul.f32 -1.442695, %v3149_v13  ;;  %v7088_v24 = vld [vmem:[%s5540_s9 + $0x60] sm:$0xff] }
 0x2e5   : > { %v5361_v30 = vpop.eup %5360  ;;  %5376 = vlog2.f32 %v3345_v47  ;;  %v3282_v20 = vsub.f32 1.0, %v5359_v43  ;;  %vm3275_vm3 = vcmp.lt.f32.partialorder %v7081_v56, 0.0  ;;  %vm3276_vm4 = vcmp.lt.f32.partialorder %v7088_v24, 0.0 }
 0x2e6   : > { %5378 = vlog2.f32 %v3344_v2  ;;  %v3208_v39 = vadd.f32 1.0, %v5361_v30  ;;  %v3151_v12 = vpop.xlane.xlu0 %3150  ;;  %vm3448_vm0 = vcmask 0  }
 0x2e7   : > { %v5363_v25 = vpop.eup %5362  ;;  %v3298_v10 = vsel %vm3266_vm7, %v3282_v20, %v5359_v43  ;;  %5380 = vrcp.f32 %v3206_v19  ;;  %v3711_v21 = vmul.f32 -1.442695, %v3151_v12 }
 0x2e8   : > { %v5365_v11 = vpop.eup %5364  ;;  %v3346_v29 = vadd.f32 1e-15, %v3298_v10  ;;  %5382 = vrcp.f32 %v3207_v36  ;;  %v3209_v62 = vadd.f32 1.0, %v5363_v25 }
 0x2e9   : > { %v5367_v26 = vpop.eup %5366  ;;  %v3283_v53 = vsub.f32 1.0, %v5365_v11  ;;  %5384 = vrcp.f32 %v3208_v39 }
 0x2ea   : > { %v5369_v51 = vpop.eup %5368  ;;  %5386 = vlog2.f32 %v3346_v29  ;;  %v3284_v50 = vsub.f32 1.0, %v5367_v26 }
 0x2eb   : > { %v5371_v58 = vpop.eup %5370  ;;  %v3299_v15 = vsel %vm3267_vm8, %v3283_v53, %v5365_v11  ;;  %5388 = vrcp.f32 %v3209_v62  ;;  %v3210_v17 = vadd.f32 1.0, %v5369_v51  ;;  %v3319_v53 = vand.u32 2147483647, %v7052_v40 }
 0x2ec   : > { %v5373_v33 = vpop.eup %5372  ;;  %v3347_v5 = vadd.f32 1e-15, %v3299_v15  ;;  %v3300_v8 = vsel %vm3268_vm9, %v3284_v50, %v5367_v26  ;;  %v3211_v9 = vadd.f32 1.0, %v5371_v58  ;;  %5390 = vpow2.f32 %v3709_v46 }
 0x2ed   : > { %v3348_v52 = vadd.f32 1e-15, %v3300_v8  ;;  %5392 = vrcp.f32 %v3210_v17  ;;  %v3212_v48 = vadd.f32 1.0, %v5373_v33 }
 0x2ee   : > { %v5375_v45 = vpop.eup %5374  ;;  %5394 = vlog2.f32 %v3347_v5 }
 0x2ef   : > { %v5377_v14 = vpop.eup %5376  ;;  %5396 = vlog2.f32 %v3348_v52  ;;  %v3285_v49 = vsub.f32 1.0, %v5375_v45 }
 0x2f0   : > { %v5379_v0 = vpop.eup %5378  ;;  %v3363_v7 = vmul.f32 0.6931472, %v5377_v14  ;;  %5398 = vrcp.f32 %v3211_v9 }
 0x2f1   : > { %v5381_v23 = vpop.eup %5380  ;;  %v3361_v32 = vmul.f32 0.6931472, %v5379_v0  ;;  %v3301_v37 = vsel %vm3269_vm10, %v3285_v49, %v5375_v45  ;;  %5400 = vrcp.f32 %v3212_v48  ;;  %v3320_v48 = vand.u32 2147483647, %v7055_v44 }
 0x2f2   : > { %v5383_v63 = vpop.eup %5382  ;;  %v3393_v47 = vmul.f32 %v3363_v7, %v7043_v6  ;;  %v3349_v22 = vadd.f32 1e-15, %v3301_v37  ;;  %v3286_v18 = vsub.f32 1.0, %v5381_v23  ;;  %5402 = vpow2.f32 %v3710_v59 }
 0x2f3   : > { %v5385_v19 = vpop.eup %5384  ;;  %v3392_v43 = vmul.f32 %v3361_v32, %v3328_v27  ;;  %v3287_v2 = vsub.f32 1.0, %v5383_v63  ;;  %5404 = vpow2.f32 %v3711_v21 }
 0x2f4   : > { %v5387_v41 = vpop.eup %5386  ;;  %5406 = vlog2.f32 %v3349_v22  ;;  %v3302_v31 = vsel %vm3270_vm11, %v3286_v18, %v5381_v23  ;;  %v3288_v36 = vsub.f32 1.0, %v5385_v19  ;;  %v3411_v60 = vsel %vm3409_vm12, %v3393_v47, 0.0  ;;  %v7121_v18 = vld [vmem:[%s5540_s9 + $0x68] sm:$0xff] }
 0x2f5   : > { %v5389_v30 = vpop.eup %5388  ;;  %v3365_v1 = vmul.f32 0.6931472, %v5387_v41  ;;  %v3350_v20 = vadd.f32 1e-15, %v3302_v31  ;;  %v3303_v4 = vsel %vm3271_vm13, %v3287_v2, %v5383_v63  ;;  %v3410_v39 = vsel %vm3409_vm12, %v3392_v43, 0.0 }
 0x2f6   : > { %v5391_v6 = vpop.eup %5390  ;;  %v3351_v25 = vadd.f32 1e-15, %v3303_v4  ;;  %v3304_v10 = vsel %vm3272_vm14, %v3288_v36, %v5385_v19  ;;  %v3289_v11 = vsub.f32 1.0, %v5389_v30  ;;  %v3412_v13 = vadd.f32 %v3411_v60, %v3410_v39 }
 0x2f7   : > { %v5393_v29 = vpop.eup %5392  ;;  %v3394_v62 = vmul.f32 %v3365_v1, %v7057_v28  ;;  %5408 = vlog2.f32 %v3350_v20  ;;  %v3352_v46 = vadd.f32 1e-15, %v3304_v10  ;;  %v3213_v26 = vadd.f32 1.0, %v5391_v6 }
 0x2f8   : > { %v5395_v27 = vpop.eup %5394  ;;  %5410 = vlog2.f32 %v3351_v25  ;;  %v3305_v51 = vsel %vm3273_vm1, %v3289_v11, %v5389_v30  ;;  %v3290_v57 = vsub.f32 1.0, %v5393_v29  ;;  %v3334_v47 = vsub.f32 0.0, %v3318_v38  ;;  %v3262_v11 = vld [vmem:[%s5540_s9 + $0x70] sm:$0xff] }
 0x2f9   : > { %v5397_v16 = vpop.eup %5396  ;;  %v3413_v50 = vsel %vm3409_vm12, %v3394_v62, 0.0  ;;  %v3367_v58 = vmul.f32 0.6931472, %v5395_v27  ;;  %5412 = vlog2.f32 %v3352_v46  ;;  %v3353_v15 = vadd.f32 1e-15, %v3305_v51 }
 0x2fa   : > { %v5399_v17 = vpop.eup %5398  ;;  %v3369_v28 = vmul.f32 0.6931472, %v5397_v16  ;;  %v3306_v33 = vsel %vm3274_vm2, %v3290_v57, %v5393_v29  ;;  %5414 = vrcp.f32 %v3213_v26  ;;  %v3414_v52 = vadd.f32 %v3413_v50, %v3412_v13 }
 0x2fb   : > { %v5401_v5 = vpop.eup %5400  ;;  %v3395_v40 = vmul.f32 %v3367_v58, %v7073_v55  ;;  %5416 = vlog2.f32 %v3353_v15  ;;  %v3354_v8 = vadd.f32 1e-15, %v3306_v33  ;;  %v3291_v9 = vsub.f32 1.0, %v5399_v17 }
 0x2fc   : > { %v5403_v12 = vpop.eup %5402  ;;  %v3396_v3 = vmul.f32 %v3369_v28, %v7075_v35  ;;  %v3292_v45 = vsub.f32 1.0, %v5401_v5  ;;  %v3321_v22 = vand.u32 2147483647, %v7067_v54  ;;  %v3335_v2 = vsub.f32 0.0, %v3319_v53  ;;  %v3263_v28 = vld [vmem:[%s5540_s9 + $0x78] sm:$0xff] }
 0x2fd   : > { %v5405_v59 = vpop.eup %5404  ;;  %v3415_v14 = vsel %vm3409_vm12, %v3395_v40, 0.0  ;;  %5418 = vlog2.f32 %v3354_v8  ;;  %v3307_v49 = vsel %vm3275_vm3, %v3291_v9, %v5399_v17  ;;  %v3214_v21 = vadd.f32 1.0, %v5403_v12 }
 0x2fe   : > { %v5407_v55 = vpop.eup %5406  ;;  %v3416_v0 = vadd.f32 %v3415_v14, %v3414_v52  ;;  %v3417_v7 = vsel %vm3409_vm12, %v3396_v3, 0.0  ;;  %v3355_v23 = vadd.f32 1e-15, %v3307_v49  ;;  %v3308_v35 = vsel %vm3276_vm4, %v3292_v45, %v5401_v5 }
 0x2ff   : > { %v3371_v32 = vmul.f32 0.6931472, %v5407_v55  ;;  %v3356_v44 = vadd.f32 1e-15, %v3308_v35  ;;  %5420 = vrcp.f32 %v3214_v21  ;;  %v3215_v37 = vadd.f32 1.0, %v5405_v59 }
 0x300   : > { %v3418_v63 = vadd.f32 %v3417_v7, %v3416_v0  ;;  %5422 = vlog2.f32 %v3355_v23  ;;  %v3336_v36 = vsub.f32 0.0, %v3320_v48  ;;  %v3322_v30 = vand.u32 2147483647, %v7071_v42 }
 0x301   : > { %v5409_v19 = vpop.eup %5408  ;;  %v3397_v43 = vmul.f32 %v3371_v32, %v7083_v61  ;;  %5424 = vlog2.f32 %v3356_v44  ;;  %vm3277_vm5 = vcmp.lt.f32.partialorder %v7121_v18, 0.0  ;;  %v3337_v61 = vsub.f32 0.0, %v3321_v22 }
 0x302   : > { %v5411_v41 = vpop.eup %5410  ;;  %v3373_v31 = vmul.f32 0.6931472, %v5409_v19  ;;  %5426 = vrcp.f32 %v3215_v37  ;;  %v3323_v25 = vand.u32 2147483647, %v7081_v56  ;;  %v3338_v46 = vsub.f32 0.0, %v3322_v30 }
 0x303   : > { %v5413_v60 = vpop.eup %5412  ;;  %v3419_v34 = vsel %vm3409_vm12, %v3397_v43, 0.0  ;;  %v3375_v38 = vmul.f32 0.6931472, %v5411_v41  ;;  %vm3278_vm6 = vcmp.lt.f32.partialorder %v3262_v11, 0.0  ;;  %v3324_v13 = vand.u32 2147483647, %v7088_v24 }
 0x304   : > { %v5415_v54 = vpop.eup %5414  ;;  %v3420_v1 = vadd.f32 %v3419_v34, %v3418_v63  ;;  %v3398_v20 = vmul.f32 %v3373_v31, %v3334_v47  ;;  %v3377_v4 = vmul.f32 0.6931472, %v5413_v60  ;;  %v3339_v17 = vsub.f32 0.0, %v3323_v25 }
 0x305   : > { %v5417_v6 = vpop.eup %5416  ;;  %v3399_v39 = vmul.f32 %v3375_v38, %v3335_v2  ;;  %v3293_v10 = vsub.f32 1.0, %v5415_v54  ;;  %vm3279_vm15 = vcmp.lt.f32.partialorder %v3263_v28, 0.0  ;;  %v3340_v21 = vsub.f32 0.0, %v3324_v13 }
 0x306   : > { %v3421_v42 = vsel %vm3409_vm12, %v3398_v20, 0.0  ;;  %v3400_v29 = vmul.f32 %v3377_v4, %v3336_v36  ;;  %v3379_v62 = vmul.f32 0.6931472, %v5417_v6  ;;  %v3325_v7 = vand.u32 2147483647, %v7121_v18 }
 0x307   : > { %v5419_v26 = vpop.eup %5418  ;;  %v3422_v27 = vadd.f32 %v3421_v42, %v3420_v1  ;;  %v3423_v53 = vsel %vm3409_vm12, %v3399_v39, 0.0  ;;  %v3309_v51 = vsel %vm3277_vm5, %v3293_v10, %v5415_v54  ;;  %v3326_v22 = vand.u32 2147483647, %v3262_v11 }
 0x308   : > { %v3401_v57 = vmul.f32 %v3379_v62, %v3337_v61  ;;  %v3381_v16 = vmul.f32 0.6931472, %v5419_v26  ;;  %v3357_v50 = vadd.f32 1e-15, %v3309_v51  ;;  %v3425_v15 = vsel %vm3409_vm12, %v3400_v29, 0.0  ;;  %v3455_v51 = vld [vmem:[%s7191_s5 + $0x8] sm:$0xff] (!%p3712_p5) }
 0x309   : > { %v5421_v56 = vpop.eup %5420  ;;  %v3424_v58 = vadd.f32 %v3423_v53, %v3422_v27  ;;  %v3341_v63 = vsub.f32 0.0, %v3325_v7  ;;  %v3327_v31 = vand.u32 2147483647, %v3263_v28  ;;  %v3342_v36 = vsub.f32 0.0, %v3326_v22  ;;  %v3454_v53 = vld [vmem:[%s7191_s5] sm:$0xff] (!%p3712_p5) }
 0x30a   : > { %v5423_v33 = vpop.eup %5422  ;;  %v3427_v5 = vsel %vm3409_vm12, %v3401_v57, 0.0  ;;  %v3402_v40 = vmul.f32 %v3381_v16, %v3338_v46  ;;  %5428 = vlog2.f32 %v3357_v50  ;;  %v3294_v8 = vsub.f32 1.0, %v5421_v56  ;;  %v3408_v46 = vld [vmem:[#allocation2] sm:$0x1] }
 0x30b   : > { %v5425_v9 = vpop.eup %5424  ;;  %v3426_v12 = vadd.f32 %v3425_v15, %v3424_v58  ;;  %v3383_v52 = vmul.f32 0.6931472, %v5423_v33  ;;  %v3343_v38 = vsub.f32 0.0, %v3327_v31  ;;  %v3456_v57 = vmin.f32 (!%p3712_p5), %v3454_v53, 10.0  ;;  %v3460_v58 = vld [vmem:[%s7190_s4] sm:$0xff] (!%p3712_p5)  ;;  %v3461_v15 = vld [vmem:[%s7190_s4 + $0x8] sm:$0xff] (!%p3712_p5) }
 0x30c   : > { %v5427_v3 = vpop.eup %5426  ;;  %v3310_v48 = vsel %vm3278_vm6, %v3294_v8, %v5421_v56  ;;  %v3429_v24 = vsel %vm3409_vm12, %v3402_v40, 0.0  ;;  %v3385_v55 = vmul.f32 0.6931472, %v5425_v9  ;;  %v3457_v16 = vmin.f32 (!%p3712_p5), %v3455_v51, 10.0 }
 0x30d   : > { %v3428_v45 = vadd.f32 %v3427_v5, %v3426_v12  ;;  %v3403_v59 = vmul.f32 %v3383_v52, %v3339_v17  ;;  %v3358_v14 = vadd.f32 1e-15, %v3310_v48  ;;  %v3295_v49 = vsub.f32 1.0, %v5427_v3 }
 0x30e   : > { %v3404_v44 = vmul.f32 %v3385_v55, %v3340_v21  ;;  %v3466_v50 = vmul.f32 (!%p3712_p5), 1.442695, %v3456_v57  ;;  %v3468_v56 = vmul.f32 (!%p3712_p5), 1.442695, %v3457_v16  ;;  %v3458_v17 = vadd.f32 (!%p3712_p5), 1.0, %v3456_v57 }
 0x30f   : > { %v3430_v0 = vadd.f32 %v3429_v24, %v3428_v45  ;;  %5430 = vlog2.f32 %v3358_v14  ;;  %v3311_v23 = vsel %vm3279_vm15, %v3295_v49, %v5427_v3  ;;  %v3431_v35 = vsel %vm3409_vm12, %v3403_v59, 0.0 }
 0x310   : > { %v3359_v32 = vadd.f32 1e-15, %v3311_v23  ;;  %v3433_v43 = vsel %vm3409_vm12, %v3404_v44, 0.0  ;;  %v3462_v13 = vmul.f32 (!%p3712_p5), %v3460_v58, %v3460_v58  ;;  %v3459_v28 = vadd.f32 (!%p3712_p5), 1.0, %v3457_v16 }
 0x311   : > { %v3432_v37 = vadd.f32 %v3431_v35, %v3430_v0  ;;  %v3463_v33 = vmul.f32 (!%p3712_p5), %v3461_v15, %v3461_v15 }
 0x312   : > { %5432 = vlog2.f32 %v3359_v32  ;;  %v3464_v5 = vsub.f32 (!%p3712_p5), %v3458_v17, %v3462_v13 }
 0x313   : > { %v3434_v2 = vadd.f32 %v3433_v43, %v3432_v37  ;;  %5434 = vpow2.f32 (!%p3712_p5), %v3466_v50  ;;  %v3465_v40 = vsub.f32 (!%p3712_p5), %v3459_v28, %v3463_v33 }
 0x314   : > { %v5429_v47 = vpop.eup %5428  ;;  %5436 = vpow2.f32 (!%p3712_p5), %v3468_v56 }
 0x315   : > { %v3387_v19 = vmul.f32 0.6931472, %v5429_v47 }
 0x317   : > { %v3405_v41 = vmul.f32 %v3387_v19, %v3341_v63 }
 0x319   : > { %v5431_v30 = vpop.eup %5430  ;;  %v3435_v18 = vsel %vm3409_vm12, %v3405_v41, 0.0 }
 0x31a   : > { %v3389_v60 = vmul.f32 0.6931472, %v5431_v30  ;;  %v3436_v34 = vadd.f32 %v3435_v18, %v3434_v2 }
 0x31c   : > { %v5433_v54 = vpop.eup %5432  ;;  %v3406_v1 = vmul.f32 %v3389_v60, %v3342_v36 }
 0x31d   : > { %v3391_v20 = vmul.f32 0.6931472, %v5433_v54  ;;  %v5435_v8 = vpop.eup (!%p3712_p5), %5434 }
 0x31e   : > { %v3437_v4 = vsel %vm3409_vm12, %v3406_v1, 0.0  ;;  %v5437_v9 = vpop.eup (!%p3712_p5), %5436  ;;  %v3470_v12 = vsub.f32 (!%p3712_p5), %v3464_v5, %v5435_v8 }
 0x31f   : > { %v3438_v61 = vadd.f32 %v3437_v4, %v3436_v34  ;;  %v3407_v6 = vmul.f32 %v3391_v20, %v3343_v38  ;;  %v3471_v52 = vsub.f32 (!%p3712_p5), %v3465_v40, %v5437_v9 }
 0x320   : > { %3472 = vadd.xlane.f32.xlu0 (!%p3712_p5), %v3470_v12 }
 0x321   : > { %v3439_v39 = vsel %vm3409_vm12, %v3407_v6, 0.0 }
 0x322   : > { %v3440_v25 = vadd.f32 %v3439_v39, %v3438_v61 }
 0x324   : > { %v3441_v10 = vrot.slane %v3440_v25, 4  ;;  %3474 = vadd.xlane.f32.xlu0 (!%p3712_p5), %v3471_v52 }
 0x326   : > { %v3442_v11 = vadd.f32 %v3441_v10, %v3440_v25 }
 0x328   : > { %v3443_v42 = vrot.slane %v3442_v11, 2 }
 0x32a   : > { %v3444_v29 = vadd.f32 %v3443_v42, %v3442_v11 }
 0x32c   : > { %v3445_v62 = vrot.slane %v3444_v29, 1  ;;  %3453 = sbr.rel (%p3712_p5) target bundleno = 965 (0x3c5), region = 52 }
 0x32e   : > { %v3446_v26 = vadd.f32 %v3445_v62, %v3444_v29 }
 0x330   : > { %v3447_v27 = vadd.f32 %v3446_v26, %v3408_v46 }
 0x332   : > { %3449 = vst.msk [vmem:[#allocation2] sm:$0x1] %vm3448_vm0, %v3447_v27 }
 0x339   : > { %v3483_v0 = vld [vmem:[#allocation2] sm:$0x1] }
 0x3ad   : > { %v3473_v3 = vpop.xlane.xlu0 %3472 }
 0x3b1   : > { %v3475_v48 = vpop.xlane.xlu0 %3474 }
 0x3b2   : > { %v3476_v45 = vadd.f32 %v3475_v48, %v3473_v3 }
 0x3b4   : > { %v3477_v59 = vrot.slane %v3476_v45, 4 }
 0x3b6   : > { %v3478_v14 = vadd.f32 %v3477_v59, %v3476_v45 }
 0x3b8   : > { %v3479_v49 = vrot.slane %v3478_v14, 2 }
 0x3ba   : > { %v3480_v24 = vadd.f32 %v3479_v49, %v3478_v14 }
 0x3bc   : > { %v3481_v21 = vrot.slane %v3480_v24, 1 }
 0x3be   : > { %v3482_v55 = vadd.f32 %v3481_v21, %v3480_v24 }
 0x3c0   : > { %v3484_v7 = vmul.f32 -0.00012207031, %v3482_v55 }
 0x3c2   : > { %v3485_v23 = vadd.f32 %v3484_v7, %v3483_v0 }
 0x3c4   : > { %3486 = vst.msk [vmem:[#allocation2] sm:$0x1] %vm3448_vm0, %v3485_v23 }
 0x3c5 PF: > { %p5321_p6 = scmp.eq.s32.totalorder %s5522_s22, 1  ;;  %s5480_s8 = smov [#allocation2]  }
 0x3c6   : > { %s3494_s10 = sshll.u32 %s5480_s8, 4  ;;  %s3495_s10 = int_to_ptr.vmem [resolvable:$true] %s3494_s10 }
 0x3c7   : > { %s5438_s11 = scalar_lea.vmem %s3495_s10, 16  ;;  %s5444_s12 = scalar_lea.vmem %s3495_s10, 32 }
 0x3c8   : > { %p5439_p7 = scmp.ne.s32.totalorder %s3495_s10, %s5438_s11  ;;  %p5445_p10 = scmp.lt.s32.totalorder %s3495_s10, %s3495_s10 }
 0x3c9   : > { %p5446_p11 = scmp.lt.s32.totalorder %s5444_s12, %s5438_s11 }
 0x3ca   : > { %p5440_p8 = pnand %p5439_p7, %p5321_p6 }
 0x3cb   : > { %p5447_p12 = por %p5446_p11, %p5445_p10 }
 0x3cc   : > { %p5441_p9 = pneg %p5440_p8 }
 0x3ce   : > { %p5448_p13 = pnand %p5447_p12, %p5441_p9 }
 0x3d0   : > { %5451 = shalt.err (!%p5448_p13)
}
 0x3d1   : > { %s5452_s15 = scalar_lea.hbm %s7192_s6, 16 }
 0x3d2   : > { %p5453_p0 = scmp.ne.s32.totalorder %s7192_s6, %s5452_s15  ;;  %p5458_p3 = scmp.lt.u32.totalorder %s5452_s15, %s7192_s6 }
 0x3d4   : > { %p5454_p1 = pnand %p5453_p0, %p5321_p6 }
 0x3d6   : > { %p5455_p2 = pneg %p5454_p1 }
 0x3d8   : > { %p5460_p4 = pnand %p5458_p3, %p5455_p2 }
 0x3da   : > { %5463 = shalt.err (!%p5460_p4)
}
 0x3db   : > { %5318 = dma.vmem_to_hbm [thread:$0]  (%p5321_p6), %s3495_s10, 16, %s7192_s6, [#allocation3]  }
 0x3dc   : > { %5469 = dma.done.wait (%p5321_p6), [#allocation3], 16  }
 0x3dd   : > { %5471 = vsyncadd (%p5321_p6), [#allocation3], 4294967280 }
 0x3de PF: > { %s17_s21 = sadd.s32 1, %s5474_s21  }
 0x3df   : > { %p14_p5 = scmp.ge.s32.totalorder %s17_s21, 4  }
 0x3e1   :  { %16 = sbr.rel (!%p14_p5) target bundleno = 1 (0x1), region = 85 }
 0x3e8   :  { %3507 = vsyncpa [#allocation3], 1 }
 0x3e9   :  { %3509 = vsyncpa [#allocation3 + $0x1], 1 }

</bundles_post_ra>
